<compile_context>
chip_gen: v7x
topology: tpu7x:2x2x1
jax: 0.10.0
libtpu: 0.0.40
codegen_flags: <defaults>
</compile_context>

<pallas_src>
import functools

import jax
import jax.numpy as jnp
from jax.experimental import pallas as pl
from jax.experimental.pallas import tpu as pltpu


def neurolingo_kernel(T, Bp, H,
                      emb_ref, wih_ref, whh_ref, b_ref, wfc_ref, bfc_ref,
                      logp_ref, h_out_ref, c_out_ref,
                      gx_sc, hs_sc, h_sc, c_sc):
    # ---- Phase 1: hoisted input projection, one batched MXU matmul --------
    # (T*Bp, E) @ (E, 4H) + b  -> gates_x for every (t, b) row at once.
    gx_sc[...] = (jnp.dot(emb_ref[...], wih_ref[...],
                          preferred_element_type=jnp.float32)
                  + b_ref[...])

    # ---- Phase 2: serial LSTM recurrence (only h @ W_hh per step) ---------
    h_sc[...] = jnp.zeros_like(h_sc)   # hidden=None -> zero initial state
    c_sc[...] = jnp.zeros_like(c_sc)

    def step(t, carry):
        row = pl.multiple_of(t * Bp, Bp)
        gates = (gx_sc[pl.ds(row, Bp), :]
                 + jnp.dot(h_sc[...], whh_ref[...],
                           preferred_element_type=jnp.float32))   # (Bp, 4H)

        # PyTorch gate layout: [i, f, g, o] along the 4H axis.
        i_g = jax.nn.sigmoid(gates[:, 0 * H:1 * H])
        f_g = jax.nn.sigmoid(gates[:, 1 * H:2 * H])
        g_g = jnp.tanh(gates[:, 2 * H:3 * H])
        o_g = jax.nn.sigmoid(gates[:, 3 * H:4 * H])

        c_new = f_g * c_sc[...] + i_g * g_g
        h_new = o_g * jnp.tanh(c_new)
        c_sc[...] = c_new
        h_sc[...] = h_new
        hs_sc[pl.ds(row, Bp), :] = h_new
        return carry

    jax.lax.fori_loop(0, T, step, 0, unroll=True)

    # ---- Phase 3: batched FC + log-softmax, lane-dense output -------------
    logits = (jnp.dot(hs_sc[...], wfc_ref[...],
                      preferred_element_type=jnp.float32)
              + bfc_ref[...])                                     # (T*Bp, Vp)
    m = jnp.max(logits, axis=-1, keepdims=True)
    lse = jnp.log(jnp.sum(jnp.exp(logits - m), axis=-1, keepdims=True)) + m
    logp_ref[...] = logits - lse

    h_out_ref[...] = h_sc[...]
    c_out_ref[...] = c_sc[...]


def neurolingo_forward(x_ids, params):
    """x_ids: int32 (B, T) token ids.  Returns (logprobs (B,T,V), (h_n, c_n))."""
    emb_table, W_ih, W_hh, b_gates, W_fc, b_fc = params
    B, T = x_ids.shape
    E = emb_table.shape[1]
    H = W_hh.shape[0]
    V = W_fc.shape[1]

    Bp = ((B + 7) // 8) * 8          # pad batch to full sublanes
    Vp = ((V + 127) // 128) * 128    # pad vocab to full lanes (dense stores)

    # Embedding gather directly in time-major order (glue; no transpose of
    # the embedded tensor).
    emb_t = emb_table[x_ids.T]                       # (T, B, E)
    if Bp != B:
        emb_t = jnp.pad(emb_t, ((0, 0), (0, Bp - B), (0, 0)))
    emb2d = emb_t.reshape(T * Bp, E)                 # (T*Bp, E), row = t*Bp + b

    if Vp != V:
        W_fc_p = jnp.pad(W_fc, ((0, 0), (0, Vp - V)))
        # Padded vocab columns get a hugely negative bias so exp() kills them
        # in the log-softmax normalizer.
        b_fc_p = jnp.pad(b_fc, ((0, 0), (0, Vp - V)), constant_values=-1e30)
    else:
        W_fc_p, b_fc_p = W_fc, b_fc

    kernel = functools.partial(neurolingo_kernel, T, Bp, H)

    out_shapes = (
        jax.ShapeDtypeStruct((T * Bp, Vp), jnp.float32),   # log-probs (flat)
        jax.ShapeDtypeStruct((Bp, H), jnp.float32),        # h_n (padded)
        jax.ShapeDtypeStruct((Bp, H), jnp.float32),        # c_n (padded)
    )

    logp2d, h_n, c_n = pl.pallas_call(
        kernel,
        out_shape=out_shapes,
        grid_spec=pltpu.PrefetchScalarGridSpec(
            num_scalar_prefetch=0,
            grid=(1,),
            in_specs=[
                pl.BlockSpec((T * Bp, E), lambda i: (0, 0)),
                pl.BlockSpec((E, 4 * H), lambda i: (0, 0)),
                pl.BlockSpec((H, 4 * H), lambda i: (0, 0)),
                pl.BlockSpec((1, 4 * H), lambda i: (0, 0)),
                pl.BlockSpec((H, Vp), lambda i: (0, 0)),
                pl.BlockSpec((1, Vp), lambda i: (0, 0)),
            ],
            out_specs=(
                pl.BlockSpec((T * Bp, Vp), lambda i: (0, 0)),
                pl.BlockSpec((Bp, H), lambda i: (0, 0)),
                pl.BlockSpec((Bp, H), lambda i: (0, 0)),
            ),
            scratch_shapes=[
                pltpu.VMEM((T * Bp, 4 * H), jnp.float32),  # hoisted gates_x
                pltpu.VMEM((T * Bp, H), jnp.float32),      # all hidden states
                pltpu.VMEM((Bp, H), jnp.float32),          # h carry
                pltpu.VMEM((Bp, H), jnp.float32),          # c carry
            ],
        ),
        compiler_params=pltpu.CompilerParams(
            dimension_semantics=("arbitrary",),
            vmem_limit_bytes=64 * 1024 * 1024,
        ),
    )(emb2d, W_ih, W_hh, b_gates, W_fc_p, b_fc_p)

    logp = logp2d.reshape(T, Bp, Vp)[:, :B, :V]      # drop padding
    logp = jnp.transpose(logp, (1, 0, 2))            # (B, T, V) batch_first
    hidden = (h_n[:B][None, :, :], c_n[:B][None, :, :])   # (1, B, H) each
    return logp, hidden


def _reference_forward(x_ids, params):
    """Pure-JAX reference (same math) for a correctness check."""
    emb_table, W_ih, W_hh, b_gates, W_fc, b_fc = params
    H = W_hh.shape[0]
    emb = emb_table[x_ids]                           # (B, T, E)
    B = emb.shape[0]

    def step(carry, x_t):
        h, c = carry
        gates = x_t @ W_ih + h @ W_hh + b_gates[0]
        i = jax.nn.sigmoid(gates[:, 0 * H:1 * H])
        f = jax.nn.sigmoid(gates[:, 1 * H:2 * H])
        g = jnp.tanh(gates[:, 2 * H:3 * H])
        o = jax.nn.sigmoid(gates[:, 3 * H:4 * H])
        c_new = f * c + i * g
        h_new = o * jnp.tanh(c_new)
        return (h_new, c_new), h_new

    h0 = jnp.zeros((B, H), jnp.float32)
    c0 = jnp.zeros((B, H), jnp.float32)
    (h_n, c_n), hs = jax.lax.scan(step, (h0, c0), jnp.transpose(emb, (1, 0, 2)))
    hs = jnp.transpose(hs, (1, 0, 2))                # (B, T, H)
    logits = hs @ W_fc + b_fc[0]
    logp = jax.nn.log_softmax(logits, axis=-1)
    return logp, (h_n[None], c_n[None])


def make_params(key, vocab_size, embedding_dim, hidden_dim):
    ks = jax.random.split(key, 7)
    scale = 0.1
    emb_table = scale * jax.random.normal(ks[0], (vocab_size, embedding_dim), jnp.float32)
    # stored transposed vs. PyTorch: (E, 4H), (H, 4H), (H, V)
    W_ih = scale * jax.random.normal(ks[1], (embedding_dim, 4 * hidden_dim), jnp.float32)
    W_hh = scale * jax.random.normal(ks[2], (hidden_dim, 4 * hidden_dim), jnp.float32)
    b_ih = scale * jax.random.normal(ks[3], (4 * hidden_dim,), jnp.float32)
    b_hh = scale * jax.random.normal(ks[4], (4 * hidden_dim,), jnp.float32)
    b_gates = (b_ih + b_hh)[None, :]                 # (1, 4H)
    W_fc = scale * jax.random.normal(ks[5], (hidden_dim, vocab_size), jnp.float32)
    b_fc = scale * jax.random.normal(ks[6], (vocab_size,), jnp.float32)[None, :]
    return (emb_table, W_ih, W_hh, b_gates, W_fc, b_fc)


if __name__ == "__main__":
    vocab_size, embedding_dim, hidden_dim = 16, 64, 128
    batch, seq = 2, 8

    key = jax.random.PRNGKey(0)
    pkey, xkey = jax.random.split(key)
    params = make_params(pkey, vocab_size, embedding_dim, hidden_dim)
    x_ids = jax.random.randint(xkey, (batch, seq), 0, vocab_size, dtype=jnp.int32)

    logp, (h_n, c_n) = neurolingo_forward(x_ids, params)
    jax.block_until_ready((logp, h_n, c_n))

    ref_logp, (ref_h, ref_c) = _reference_forward(x_ids, params)
    assert logp.shape == (batch, seq, vocab_size)
    assert h_n.shape == (1, batch, hidden_dim) and c_n.shape == (1, batch, hidden_dim)
    assert jnp.allclose(logp, ref_logp, atol=1e-4), "log-prob mismatch"
    assert jnp.allclose(h_n, ref_h, atol=1e-4), "h_n mismatch"
    assert jnp.allclose(c_n, ref_c, atol=1e-4), "c_n mismatch"

    print("KERNEL_OK")
</pallas_src>

<mosaic_0001>
module attributes {stable_mosaic.version = 11 : i64} {
  func.func @neurolingo_kernel(%arg0: i32, %arg1: memref<64x64xf32, #tpu.memory_space<vmem>>, %arg2: memref<64x512xf32, #tpu.memory_space<vmem>>, %arg3: memref<128x512xf32, #tpu.memory_space<vmem>>, %arg4: memref<1x512xf32, #tpu.memory_space<vmem>>, %arg5: memref<128x128xf32, #tpu.memory_space<vmem>>, %arg6: memref<1x128xf32, #tpu.memory_space<vmem>>, %arg7: memref<64x128xf32, #tpu.memory_space<vmem>>, %arg8: memref<8x128xf32, #tpu.memory_space<vmem>>, %arg9: memref<8x128xf32, #tpu.memory_space<vmem>>, %arg10: memref<64x512xf32, #tpu.memory_space<vmem>>, %arg11: memref<64x128xf32, #tpu.memory_space<vmem>>, %arg12: memref<8x128xf32, #tpu.memory_space<vmem>>, %arg13: memref<8x128xf32, #tpu.memory_space<vmem>>) attributes {dimension_semantics = [#tpu.dimension_semantics<arbitrary>], iteration_bounds = array<i64: 1>, scalar_prefetch = 0 : i64, scratch_operands = 4 : i64, tpu.core_type = #tpu.core_type<tc>, window_params = [{pipeline_mode = #tpu.pipeline_mode<synchronous>, transform_indices = @transform_0, window_bounds = array<i64: 64, 64>}, {pipeline_mode = #tpu.pipeline_mode<synchronous>, transform_indices = @transform_1, window_bounds = array<i64: 64, 512>}, {pipeline_mode = #tpu.pipeline_mode<synchronous>, transform_indices = @transform_2, window_bounds = array<i64: 128, 512>}, {pipeline_mode = #tpu.pipeline_mode<synchronous>, transform_indices = @transform_3, window_bounds = array<i64: 1, 512>}, {pipeline_mode = #tpu.pipeline_mode<synchronous>, transform_indices = @transform_4, window_bounds = array<i64: 128, 128>}, {pipeline_mode = #tpu.pipeline_mode<synchronous>, transform_indices = @transform_5, window_bounds = array<i64: 1, 128>}, {pipeline_mode = #tpu.pipeline_mode<synchronous>, transform_indices = @transform_6, window_bounds = array<i64: 64, 128>}, {pipeline_mode = #tpu.pipeline_mode<synchronous>, transform_indices = @transform_7, window_bounds = array<i64: 8, 128>}, {pipeline_mode = #tpu.pipeline_mode<synchronous>, transform_indices = @transform_8, window_bounds = array<i64: 8, 128>}]} {
    %c0 = arith.constant 0 : index
    %c0_0 = arith.constant 0 : index
    %0 = vector.load %arg1[%c0, %c0_0] : memref<64x64xf32, #tpu.memory_space<vmem>>, vector<64x64xf32>
    %c0_1 = arith.constant 0 : index
    %c0_2 = arith.constant 0 : index
    %1 = vector.load %arg2[%c0_1, %c0_2] : memref<64x512xf32, #tpu.memory_space<vmem>>, vector<64x512xf32>
    %cst = arith.constant dense<0.000000e+00> : vector<64x512xf32>
    %2 = tpu.matmul %0, %1, %cst {dimension_numbers = #tpu.dot_dimension_numbers<[1], [0], [0], [1], [0, 0, 1, 1], [], []>} : vector<64x64xf32>, vector<64x512xf32>, vector<64x512xf32> -> vector<64x512xf32>
    %c0_3 = arith.constant 0 : index
    %c0_4 = arith.constant 0 : index
    %3 = vector.load %arg4[%c0_3, %c0_4] : memref<1x512xf32, #tpu.memory_space<vmem>>, vector<1x512xf32>
    %4 = vector.broadcast %3 : vector<1x512xf32> to vector<64x512xf32>
    %5 = arith.addf %2, %4 : vector<64x512xf32>
    %c0_5 = arith.constant 0 : index
    %c0_6 = arith.constant 0 : index
    %6 = vector.load %arg10[%c0_5, %c0_6] : memref<64x512xf32, #tpu.memory_space<vmem>>, vector<64x512xf32>
    tpu.vector_store %arg10[%c0_5, %c0_6], %5 {strides = array<i32>} : memref<64x512xf32, #tpu.memory_space<vmem>>, vector<64x512xf32>,
    %cst_7 = arith.constant 0.000000e+00 : f32
    %7 = vector.broadcast %cst_7 : f32 to vector<8x128xf32>
    %c0_8 = arith.constant 0 : index
    %c0_9 = arith.constant 0 : index
    %8 = vector.load %arg12[%c0_8, %c0_9] : memref<8x128xf32, #tpu.memory_space<vmem>>, vector<8x128xf32>
    tpu.vector_store %arg12[%c0_8, %c0_9], %7 {strides = array<i32>} : memref<8x128xf32, #tpu.memory_space<vmem>>, vector<8x128xf32>,
    %cst_10 = arith.constant 0.000000e+00 : f32
    %9 = vector.broadcast %cst_10 : f32 to vector<8x128xf32>
    %c0_11 = arith.constant 0 : index
    %c0_12 = arith.constant 0 : index
    %10 = vector.load %arg13[%c0_11, %c0_12] : memref<8x128xf32, #tpu.memory_space<vmem>>, vector<8x128xf32>
    tpu.vector_store %arg13[%c0_11, %c0_12], %9 {strides = array<i32>} : memref<8x128xf32, #tpu.memory_space<vmem>>, vector<8x128xf32>,
    %c0_i32 = arith.constant 0 : i32
    %c8_i32 = arith.constant 8 : i32
    %11 = arith.muli %c0_i32, %c8_i32 : i32
    %12 = tpu.assume_multiple %11, 8 : i32
    %13 = arith.index_cast %12 : i32 to index
    %c0_13 = arith.constant 0 : index
    %14 = vector.load %arg10[%13, %c0_13] : memref<64x512xf32, #tpu.memory_space<vmem>>, vector<8x512xf32>
    %c0_14 = arith.constant 0 : index
    %c0_15 = arith.constant 0 : index
    %15 = vector.load %arg12[%c0_14, %c0_15] : memref<8x128xf32, #tpu.memory_space<vmem>>, vector<8x128xf32>
    %c0_16 = arith.constant 0 : index
    %c0_17 = arith.constant 0 : index
    %16 = vector.load %arg3[%c0_16, %c0_17] : memref<128x512xf32, #tpu.memory_space<vmem>>, vector<128x512xf32>
    %cst_18 = arith.constant dense<0.000000e+00> : vector<8x512xf32>
    %17 = tpu.matmul %15, %16, %cst_18 {dimension_numbers = #tpu.dot_dimension_numbers<[1], [0], [0], [1], [0, 0, 1, 1], [], []>} : vector<8x128xf32>, vector<128x512xf32>, vector<8x512xf32> -> vector<8x512xf32>
    %18 = arith.addf %14, %17 : vector<8x512xf32>
    %19 = vector.extract_strided_slice %18 {offsets = [0, 0], sizes = [8, 128], strides = [1, 1]} : vector<8x512xf32> to vector<8x128xf32>
    %20 = arith.negf %19 : vector<8x128xf32>
    %21 = math.exp %20 : vector<8x128xf32>
    %cst_19 = arith.constant 1.000000e+00 : f32
    %22 = vector.broadcast %cst_19 : f32 to vector<8x128xf32>
    %23 = arith.addf %22, %21 : vector<8x128xf32>
    %24 = arith.divf %22, %23 : vector<8x128xf32>
    %25 = vector.extract_strided_slice %18 {offsets = [0, 128], sizes = [8, 128], strides = [1, 1]} : vector<8x512xf32> to vector<8x128xf32>
    %26 = arith.negf %25 : vector<8x128xf32>
    %27 = math.exp %26 : vector<8x128xf32>
    %cst_20 = arith.constant 1.000000e+00 : f32
    %28 = vector.broadcast %cst_20 : f32 to vector<8x128xf32>
    %29 = arith.addf %28, %27 : vector<8x128xf32>
    %30 = arith.divf %28, %29 : vector<8x128xf32>
    %31 = vector.extract_strided_slice %18 {offsets = [0, 256], sizes = [8, 128], strides = [1, 1]} : vector<8x512xf32> to vector<8x128xf32>
    %32 = math.tanh %31 : vector<8x128xf32>
    %33 = vector.extract_strided_slice %18 {offsets = [0, 384], sizes = [8, 128], strides = [1, 1]} : vector<8x512xf32> to vector<8x128xf32>
    %34 = arith.negf %33 : vector<8x128xf32>
    %35 = math.exp %34 : vector<8x128xf32>
    %cst_21 = arith.constant 1.000000e+00 : f32
    %36 = vector.broadcast %cst_21 : f32 to vector<8x128xf32>
    %37 = arith.addf %36, %35 : vector<8x128xf32>
    %38 = arith.divf %36, %37 : vector<8x128xf32>
    %c0_22 = arith.constant 0 : index
    %c0_23 = arith.constant 0 : index
    %39 = vector.load %arg13[%c0_22, %c0_23] : memref<8x128xf32, #tpu.memory_space<vmem>>, vector<8x128xf32>
    %40 = arith.mulf %30, %39 : vector<8x128xf32>
    %41 = arith.mulf %24, %32 : vector<8x128xf32>
    %42 = arith.addf %40, %41 : vector<8x128xf32>
    %43 = math.tanh %42 : vector<8x128xf32>
    %44 = arith.mulf %38, %43 : vector<8x128xf32>
    %c0_24 = arith.constant 0 : index
    %c0_25 = arith.constant 0 : index
    %45 = vector.load %arg13[%c0_24, %c0_25] : memref<8x128xf32, #tpu.memory_space<vmem>>, vector<8x128xf32>
    tpu.vector_store %arg13[%c0_24, %c0_25], %42 {strides = array<i32>} : memref<8x128xf32, #tpu.memory_space<vmem>>, vector<8x128xf32>,
    %c0_26 = arith.constant 0 : index
    %c0_27 = arith.constant 0 : index
    %46 = vector.load %arg12[%c0_26, %c0_27] : memref<8x128xf32, #tpu.memory_space<vmem>>, vector<8x128xf32>
    tpu.vector_store %arg12[%c0_26, %c0_27], %44 {strides = array<i32>} : memref<8x128xf32, #tpu.memory_space<vmem>>, vector<8x128xf32>,
    %47 = arith.index_cast %12 : i32 to index
    %c0_28 = arith.constant 0 : index
    %48 = vector.load %arg11[%47, %c0_28] : memref<64x128xf32, #tpu.memory_space<vmem>>, vector<8x128xf32>
    tpu.vector_store %arg11[%47, %c0_28], %44 {strides = array<i32>} : memref<64x128xf32, #tpu.memory_space<vmem>>, vector<8x128xf32>,
    %c1_i32 = arith.constant 1 : i32
    %c8_i32_29 = arith.constant 8 : i32
    %49 = arith.muli %c1_i32, %c8_i32_29 : i32
    %50 = tpu.assume_multiple %49, 8 : i32
    %51 = arith.index_cast %50 : i32 to index
    %c0_30 = arith.constant 0 : index
    %52 = vector.load %arg10[%51, %c0_30] : memref<64x512xf32, #tpu.memory_space<vmem>>, vector<8x512xf32>
    %c0_31 = arith.constant 0 : index
    %c0_32 = arith.constant 0 : index
    %53 = vector.load %arg12[%c0_31, %c0_32] : memref<8x128xf32, #tpu.memory_space<vmem>>, vector<8x128xf32>
    %c0_33 = arith.constant 0 : index
    %c0_34 = arith.constant 0 : index
    %54 = vector.load %arg3[%c0_33, %c0_34] : memref<128x512xf32, #tpu.memory_space<vmem>>, vector<128x512xf32>
    %cst_35 = arith.constant dense<0.000000e+00> : vector<8x512xf32>
    %55 = tpu.matmul %53, %54, %cst_35 {dimension_numbers = #tpu.dot_dimension_numbers<[1], [0], [0], [1], [0, 0, 1, 1], [], []>} : vector<8x128xf32>, vector<128x512xf32>, vector<8x512xf32> -> vector<8x512xf32>
    %56 = arith.addf %52, %55 : vector<8x512xf32>
    %57 = vector.extract_strided_slice %56 {offsets = [0, 0], sizes = [8, 128], strides = [1, 1]} : vector<8x512xf32> to vector<8x128xf32>
    %58 = arith.negf %57 : vector<8x128xf32>
    %59 = math.exp %58 : vector<8x128xf32>
    %cst_36 = arith.constant 1.000000e+00 : f32
    %60 = vector.broadcast %cst_36 : f32 to vector<8x128xf32>
    %61 = arith.addf %60, %59 : vector<8x128xf32>
    %62 = arith.divf %60, %61 : vector<8x128xf32>
    %63 = vector.extract_strided_slice %56 {offsets = [0, 128], sizes = [8, 128], strides = [1, 1]} : vector<8x512xf32> to vector<8x128xf32>
    %64 = arith.negf %63 : vector<8x128xf32>
    %65 = math.exp %64 : vector<8x128xf32>
    %cst_37 = arith.constant 1.000000e+00 : f32
    %66 = vector.broadcast %cst_37 : f32 to vector<8x128xf32>
    %67 = arith.addf %66, %65 : vector<8x128xf32>
    %68 = arith.divf %66, %67 : vector<8x128xf32>
    %69 = vector.extract_strided_slice %56 {offsets = [0, 256], sizes = [8, 128], strides = [1, 1]} : vector<8x512xf32> to vector<8x128xf32>
    %70 = math.tanh %69 : vector<8x128xf32>
    %71 = vector.extract_strided_slice %56 {offsets = [0, 384], sizes = [8, 128], strides = [1, 1]} : vector<8x512xf32> to vector<8x128xf32>
    %72 = arith.negf %71 : vector<8x128xf32>
    %73 = math.exp %72 : vector<8x128xf32>
    %cst_38 = arith.constant 1.000000e+00 : f32
    %74 = vector.broadcast %cst_38 : f32 to vector<8x128xf32>
    %75 = arith.addf %74, %73 : vector<8x128xf32>
    %76 = arith.divf %74, %75 : vector<8x128xf32>
    %c0_39 = arith.constant 0 : index
    %c0_40 = arith.constant 0 : index
    %77 = vector.load %arg13[%c0_39, %c0_40] : memref<8x128xf32, #tpu.memory_space<vmem>>, vector<8x128xf32>
    %78 = arith.mulf %68, %77 : vector<8x128xf32>
    %79 = arith.mulf %62, %70 : vector<8x128xf32>
    %80 = arith.addf %78, %79 : vector<8x128xf32>
    %81 = math.tanh %80 : vector<8x128xf32>
    %82 = arith.mulf %76, %81 : vector<8x128xf32>
    %c0_41 = arith.constant 0 : index
    %c0_42 = arith.constant 0 : index
    %83 = vector.load %arg13[%c0_41, %c0_42] : memref<8x128xf32, #tpu.memory_space<vmem>>, vector<8x128xf32>
    tpu.vector_store %arg13[%c0_41, %c0_42], %80 {strides = array<i32>} : memref<8x128xf32, #tpu.memory_space<vmem>>, vector<8x128xf32>,
    %c0_43 = arith.constant 0 : index
    %c0_44 = arith.constant 0 : index
    %84 = vector.load %arg12[%c0_43, %c0_44] : memref<8x128xf32, #tpu.memory_space<vmem>>, vector<8x128xf32>
    tpu.vector_store %arg12[%c0_43, %c0_44], %82 {strides = array<i32>} : memref<8x128xf32, #tpu.memory_space<vmem>>, vector<8x128xf32>,
    %85 = arith.index_cast %50 : i32 to index
    %c0_45 = arith.constant 0 : index
    %86 = vector.load %arg11[%85, %c0_45] : memref<64x128xf32, #tpu.memory_space<vmem>>, vector<8x128xf32>
    tpu.vector_store %arg11[%85, %c0_45], %82 {strides = array<i32>} : memref<64x128xf32, #tpu.memory_space<vmem>>, vector<8x128xf32>,
    %c2_i32 = arith.constant 2 : i32
    %c8_i32_46 = arith.constant 8 : i32
    %87 = arith.muli %c2_i32, %c8_i32_46 : i32
    %88 = tpu.assume_multiple %87, 8 : i32
    %89 = arith.index_cast %88 : i32 to index
    %c0_47 = arith.constant 0 : index
    %90 = vector.load %arg10[%89, %c0_47] : memref<64x512xf32, #tpu.memory_space<vmem>>, vector<8x512xf32>
    %c0_48 = arith.constant 0 : index
    %c0_49 = arith.constant 0 : index
    %91 = vector.load %arg12[%c0_48, %c0_49] : memref<8x128xf32, #tpu.memory_space<vmem>>, vector<8x128xf32>
    %c0_50 = arith.constant 0 : index
    %c0_51 = arith.constant 0 : index
    %92 = vector.load %arg3[%c0_50, %c0_51] : memref<128x512xf32, #tpu.memory_space<vmem>>, vector<128x512xf32>
    %cst_52 = arith.constant dense<0.000000e+00> : vector<8x512xf32>
    %93 = tpu.matmul %91, %92, %cst_52 {dimension_numbers = #tpu.dot_dimension_numbers<[1], [0], [0], [1], [0, 0, 1, 1], [], []>} : vector<8x128xf32>, vector<128x512xf32>, vector<8x512xf32> -> vector<8x512xf32>
    %94 = arith.addf %90, %93 : vector<8x512xf32>
    %95 = vector.extract_strided_slice %94 {offsets = [0, 0], sizes = [8, 128], strides = [1, 1]} : vector<8x512xf32> to vector<8x128xf32>
    %96 = arith.negf %95 : vector<8x128xf32>
    %97 = math.exp %96 : vector<8x128xf32>
    %cst_53 = arith.constant 1.000000e+00 : f32
    %98 = vector.broadcast %cst_53 : f32 to vector<8x128xf32>
    %99 = arith.addf %98, %97 : vector<8x128xf32>
    %100 = arith.divf %98, %99 : vector<8x128xf32>
    %101 = vector.extract_strided_slice %94 {offsets = [0, 128], sizes = [8, 128], strides = [1, 1]} : vector<8x512xf32> to vector<8x128xf32>
    %102 = arith.negf %101 : vector<8x128xf32>
    %103 = math.exp %102 : vector<8x128xf32>
    %cst_54 = arith.constant 1.000000e+00 : f32
    %104 = vector.broadcast %cst_54 : f32 to vector<8x128xf32>
    %105 = arith.addf %104, %103 : vector<8x128xf32>
    %106 = arith.divf %104, %105 : vector<8x128xf32>
    %107 = vector.extract_strided_slice %94 {offsets = [0, 256], sizes = [8, 128], strides = [1, 1]} : vector<8x512xf32> to vector<8x128xf32>
    %108 = math.tanh %107 : vector<8x128xf32>
    %109 = vector.extract_strided_slice %94 {offsets = [0, 384], sizes = [8, 128], strides = [1, 1]} : vector<8x512xf32> to vector<8x128xf32>
    %110 = arith.negf %109 : vector<8x128xf32>
    %111 = math.exp %110 : vector<8x128xf32>
    %cst_55 = arith.constant 1.000000e+00 : f32
    %112 = vector.broadcast %cst_55 : f32 to vector<8x128xf32>
    %113 = arith.addf %112, %111 : vector<8x128xf32>
    %114 = arith.divf %112, %113 : vector<8x128xf32>
    %c0_56 = arith.constant 0 : index
    %c0_57 = arith.constant 0 : index
    %115 = vector.load %arg13[%c0_56, %c0_57] : memref<8x128xf32, #tpu.memory_space<vmem>>, vector<8x128xf32>
    %116 = arith.mulf %106, %115 : vector<8x128xf32>
    %117 = arith.mulf %100, %108 : vector<8x128xf32>
    %118 = arith.addf %116, %117 : vector<8x128xf32>
    %119 = math.tanh %118 : vector<8x128xf32>
    %120 = arith.mulf %114, %119 : vector<8x128xf32>
    %c0_58 = arith.constant 0 : index
    %c0_59 = arith.constant 0 : index
    %121 = vector.load %arg13[%c0_58, %c0_59] : memref<8x128xf32, #tpu.memory_space<vmem>>, vector<8x128xf32>
    tpu.vector_store %arg13[%c0_58, %c0_59], %118 {strides = array<i32>} : memref<8x128xf32, #tpu.memory_space<vmem>>, vector<8x128xf32>,
    %c0_60 = arith.constant 0 : index
    %c0_61 = arith.constant 0 : index
    %122 = vector.load %arg12[%c0_60, %c0_61] : memref<8x128xf32, #tpu.memory_space<vmem>>, vector<8x128xf32>
    tpu.vector_store %arg12[%c0_60, %c0_61], %120 {strides = array<i32>} : memref<8x128xf32, #tpu.memory_space<vmem>>, vector<8x128xf32>,
    %123 = arith.index_cast %88 : i32 to index
    %c0_62 = arith.constant 0 : index
    %124 = vector.load %arg11[%123, %c0_62] : memref<64x128xf32, #tpu.memory_space<vmem>>, vector<8x128xf32>
    tpu.vector_store %arg11[%123, %c0_62], %120 {strides = array<i32>} : memref<64x128xf32, #tpu.memory_space<vmem>>, vector<8x128xf32>,
    %c3_i32 = arith.constant 3 : i32
    %c8_i32_63 = arith.constant 8 : i32
    %125 = arith.muli %c3_i32, %c8_i32_63 : i32
    %126 = tpu.assume_multiple %125, 8 : i32
    %127 = arith.index_cast %126 : i32 to index
    %c0_64 = arith.constant 0 : index
    %128 = vector.load %arg10[%127, %c0_64] : memref<64x512xf32, #tpu.memory_space<vmem>>, vector<8x512xf32>
    %c0_65 = arith.constant 0 : index
    %c0_66 = arith.constant 0 : index
    %129 = vector.load %arg12[%c0_65, %c0_66] : memref<8x128xf32, #tpu.memory_space<vmem>>, vector<8x128xf32>
    %c0_67 = arith.constant 0 : index
    %c0_68 = arith.constant 0 : index
    %130 = vector.load %arg3[%c0_67, %c0_68] : memref<128x512xf32, #tpu.memory_space<vmem>>, vector<128x512xf32>
    %cst_69 = arith.constant dense<0.000000e+00> : vector<8x512xf32>
    %131 = tpu.matmul %129, %130, %cst_69 {dimension_numbers = #tpu.dot_dimension_numbers<[1], [0], [0], [1], [0, 0, 1, 1], [], []>} : vector<8x128xf32>, vector<128x512xf32>, vector<8x512xf32> -> vector<8x512xf32>
    %132 = arith.addf %128, %131 : vector<8x512xf32>
    %133 = vector.extract_strided_slice %132 {offsets = [0, 0], sizes = [8, 128], strides = [1, 1]} : vector<8x512xf32> to vector<8x128xf32>
    %134 = arith.negf %133 : vector<8x128xf32>
    %135 = math.exp %134 : vector<8x128xf32>
    %cst_70 = arith.constant 1.000000e+00 : f32
    %136 = vector.broadcast %cst_70 : f32 to vector<8x128xf32>
    %137 = arith.addf %136, %135 : vector<8x128xf32>
    %138 = arith.divf %136, %137 : vector<8x128xf32>
    %139 = vector.extract_strided_slice %132 {offsets = [0, 128], sizes = [8, 128], strides = [1, 1]} : vector<8x512xf32> to vector<8x128xf32>
    %140 = arith.negf %139 : vector<8x128xf32>
    %141 = math.exp %140 : vector<8x128xf32>
    %cst_71 = arith.constant 1.000000e+00 : f32
    %142 = vector.broadcast %cst_71 : f32 to vector<8x128xf32>
    %143 = arith.addf %142, %141 : vector<8x128xf32>
    %144 = arith.divf %142, %143 : vector<8x128xf32>
    %145 = vector.extract_strided_slice %132 {offsets = [0, 256], sizes = [8, 128], strides = [1, 1]} : vector<8x512xf32> to vector<8x128xf32>
    %146 = math.tanh %145 : vector<8x128xf32>
    %147 = vector.extract_strided_slice %132 {offsets = [0, 384], sizes = [8, 128], strides = [1, 1]} : vector<8x512xf32> to vector<8x128xf32>
    %148 = arith.negf %147 : vector<8x128xf32>
    %149 = math.exp %148 : vector<8x128xf32>
    %cst_72 = arith.constant 1.000000e+00 : f32
    %150 = vector.broadcast %cst_72 : f32 to vector<8x128xf32>
    %151 = arith.addf %150, %149 : vector<8x128xf32>
    %152 = arith.divf %150, %151 : vector<8x128xf32>
    %c0_73 = arith.constant 0 : index
    %c0_74 = arith.constant 0 : index
    %153 = vector.load %arg13[%c0_73, %c0_74] : memref<8x128xf32, #tpu.memory_space<vmem>>, vector<8x128xf32>
    %154 = arith.mulf %144, %153 : vector<8x128xf32>
    %155 = arith.mulf %138, %146 : vector<8x128xf32>
    %156 = arith.addf %154, %155 : vector<8x128xf32>
    %157 = math.tanh %156 : vector<8x128xf32>
    %158 = arith.mulf %152, %157 : vector<8x128xf32>
    %c0_75 = arith.constant 0 : index
    %c0_76 = arith.constant 0 : index
    %159 = vector.load %arg13[%c0_75, %c0_76] : memref<8x128xf32, #tpu.memory_space<vmem>>, vector<8x128xf32>
    tpu.vector_store %arg13[%c0_75, %c0_76], %156 {strides = array<i32>} : memref<8x128xf32, #tpu.memory_space<vmem>>, vector<8x128xf32>,
    %c0_77 = arith.constant 0 : index
    %c0_78 = arith.constant 0 : index
    %160 = vector.load %arg12[%c0_77, %c0_78] : memref<8x128xf32, #tpu.memory_space<vmem>>, vector<8x128xf32>
    tpu.vector_store %arg12[%c0_77, %c0_78], %158 {strides = array<i32>} : memref<8x128xf32, #tpu.memory_space<vmem>>, vector<8x128xf32>,
    %161 = arith.index_cast %126 : i32 to index
    %c0_79 = arith.constant 0 : index
    %162 = vector.load %arg11[%161, %c0_79] : memref<64x128xf32, #tpu.memory_space<vmem>>, vector<8x128xf32>
    tpu.vector_store %arg11[%161, %c0_79], %158 {strides = array<i32>} : memref<64x128xf32, #tpu.memory_space<vmem>>, vector<8x128xf32>,
    %c4_i32 = arith.constant 4 : i32
    %c8_i32_80 = arith.constant 8 : i32
    %163 = arith.muli %c4_i32, %c8_i32_80 : i32
    %164 = tpu.assume_multiple %163, 8 : i32
    %165 = arith.index_cast %164 : i32 to index
    %c0_81 = arith.constant 0 : index
    %166 = vector.load %arg10[%165, %c0_81] : memref<64x512xf32, #tpu.memory_space<vmem>>, vector<8x512xf32>
    %c0_82 = arith.constant 0 : index
    %c0_83 = arith.constant 0 : index
    %167 = vector.load %arg12[%c0_82, %c0_83] : memref<8x128xf32, #tpu.memory_space<vmem>>, vector<8x128xf32>
    %c0_84 = arith.constant 0 : index
    %c0_85 = arith.constant 0 : index
    %168 = vector.load %arg3[%c0_84, %c0_85] : memref<128x512xf32, #tpu.memory_space<vmem>>, vector<128x512xf32>
    %cst_86 = arith.constant dense<0.000000e+00> : vector<8x512xf32>
    %169 = tpu.matmul %167, %168, %cst_86 {dimension_numbers = #tpu.dot_dimension_numbers<[1], [0], [0], [1], [0, 0, 1, 1], [], []>} : vector<8x128xf32>, vector<128x512xf32>, vector<8x512xf32> -> vector<8x512xf32>
    %170 = arith.addf %166, %169 : vector<8x512xf32>
    %171 = vector.extract_strided_slice %170 {offsets = [0, 0], sizes = [8, 128], strides = [1, 1]} : vector<8x512xf32> to vector<8x128xf32>
    %172 = arith.negf %171 : vector<8x128xf32>
    %173 = math.exp %172 : vector<8x128xf32>
    %cst_87 = arith.constant 1.000000e+00 : f32
    %174 = vector.broadcast %cst_87 : f32 to vector<8x128xf32>
    %175 = arith.addf %174, %173 : vector<8x128xf32>
    %176 = arith.divf %174, %175 : vector<8x128xf32>
    %177 = vector.extract_strided_slice %170 {offsets = [0, 128], sizes = [8, 128], strides = [1, 1]} : vector<8x512xf32> to vector<8x128xf32>
    %178 = arith.negf %177 : vector<8x128xf32>
    %179 = math.exp %178 : vector<8x128xf32>
    %cst_88 = arith.constant 1.000000e+00 : f32
    %180 = vector.broadcast %cst_88 : f32 to vector<8x128xf32>
    %181 = arith.addf %180, %179 : vector<8x128xf32>
    %182 = arith.divf %180, %181 : vector<8x128xf32>
    %183 = vector.extract_strided_slice %170 {offsets = [0, 256], sizes = [8, 128], strides = [1, 1]} : vector<8x512xf32> to vector<8x128xf32>
    %184 = math.tanh %183 : vector<8x128xf32>
    %185 = vector.extract_strided_slice %170 {offsets = [0, 384], sizes = [8, 128], strides = [1, 1]} : vector<8x512xf32> to vector<8x128xf32>
    %186 = arith.negf %185 : vector<8x128xf32>
    %187 = math.exp %186 : vector<8x128xf32>
    %cst_89 = arith.constant 1.000000e+00 : f32
    %188 = vector.broadcast %cst_89 : f32 to vector<8x128xf32>
    %189 = arith.addf %188, %187 : vector<8x128xf32>
    %190 = arith.divf %188, %189 : vector<8x128xf32>
    %c0_90 = arith.constant 0 : index
    %c0_91 = arith.constant 0 : index
    %191 = vector.load %arg13[%c0_90, %c0_91] : memref<8x128xf32, #tpu.memory_space<vmem>>, vector<8x128xf32>
    %192 = arith.mulf %182, %191 : vector<8x128xf32>
    %193 = arith.mulf %176, %184 : vector<8x128xf32>
    %194 = arith.addf %192, %193 : vector<8x128xf32>
    %195 = math.tanh %194 : vector<8x128xf32>
    %196 = arith.mulf %190, %195 : vector<8x128xf32>
    %c0_92 = arith.constant 0 : index
    %c0_93 = arith.constant 0 : index
    %197 = vector.load %arg13[%c0_92, %c0_93] : memref<8x128xf32, #tpu.memory_space<vmem>>, vector<8x128xf32>
    tpu.vector_store %arg13[%c0_92, %c0_93], %194 {strides = array<i32>} : memref<8x128xf32, #tpu.memory_space<vmem>>, vector<8x128xf32>,
    %c0_94 = arith.constant 0 : index
    %c0_95 = arith.constant 0 : index
    %198 = vector.load %arg12[%c0_94, %c0_95] : memref<8x128xf32, #tpu.memory_space<vmem>>, vector<8x128xf32>
    tpu.vector_store %arg12[%c0_94, %c0_95], %196 {strides = array<i32>} : memref<8x128xf32, #tpu.memory_space<vmem>>, vector<8x128xf32>,
    %199 = arith.index_cast %164 : i32 to index
    %c0_96 = arith.constant 0 : index
    %200 = vector.load %arg11[%199, %c0_96] : memref<64x128xf32, #tpu.memory_space<vmem>>, vector<8x128xf32>
    tpu.vector_store %arg11[%199, %c0_96], %196 {strides = array<i32>} : memref<64x128xf32, #tpu.memory_space<vmem>>, vector<8x128xf32>,
    %c5_i32 = arith.constant 5 : i32
    %c8_i32_97 = arith.constant 8 : i32
    %201 = arith.muli %c5_i32, %c8_i32_97 : i32
    %202 = tpu.assume_multiple %201, 8 : i32
    %203 = arith.index_cast %202 : i32 to index
    %c0_98 = arith.constant 0 : index
    %204 = vector.load %arg10[%203, %c0_98] : memref<64x512xf32, #tpu.memory_space<vmem>>, vector<8x512xf32>
    %c0_99 = arith.constant 0 : index
    %c0_100 = arith.constant 0 : index
    %205 = vector.load %arg12[%c0_99, %c0_100] : memref<8x128xf32, #tpu.memory_space<vmem>>, vector<8x128xf32>
    %c0_101 = arith.constant 0 : index
    %c0_102 = arith.constant 0 : index
    %206 = vector.load %arg3[%c0_101, %c0_102] : memref<128x512xf32, #tpu.memory_space<vmem>>, vector<128x512xf32>
    %cst_103 = arith.constant dense<0.000000e+00> : vector<8x512xf32>
    %207 = tpu.matmul %205, %206, %cst_103 {dimension_numbers = #tpu.dot_dimension_numbers<[1], [0], [0], [1], [0, 0, 1, 1], [], []>} : vector<8x128xf32>, vector<128x512xf32>, vector<8x512xf32> -> vector<8x512xf32>
    %208 = arith.addf %204, %207 : vector<8x512xf32>
    %209 = vector.extract_strided_slice %208 {offsets = [0, 0], sizes = [8, 128], strides = [1, 1]} : vector<8x512xf32> to vector<8x128xf32>
    %210 = arith.negf %209 : vector<8x128xf32>
    %211 = math.exp %210 : vector<8x128xf32>
    %cst_104 = arith.constant 1.000000e+00 : f32
    %212 = vector.broadcast %cst_104 : f32 to vector<8x128xf32>
    %213 = arith.addf %212, %211 : vector<8x128xf32>
    %214 = arith.divf %212, %213 : vector<8x128xf32>
    %215 = vector.extract_strided_slice %208 {offsets = [0, 128], sizes = [8, 128], strides = [1, 1]} : vector<8x512xf32> to vector<8x128xf32>
    %216 = arith.negf %215 : vector<8x128xf32>
    %217 = math.exp %216 : vector<8x128xf32>
    %cst_105 = arith.constant 1.000000e+00 : f32
    %218 = vector.broadcast %cst_105 : f32 to vector<8x128xf32>
    %219 = arith.addf %218, %217 : vector<8x128xf32>
    %220 = arith.divf %218, %219 : vector<8x128xf32>
    %221 = vector.extract_strided_slice %208 {offsets = [0, 256], sizes = [8, 128], strides = [1, 1]} : vector<8x512xf32> to vector<8x128xf32>
    %222 = math.tanh %221 : vector<8x128xf32>
    %223 = vector.extract_strided_slice %208 {offsets = [0, 384], sizes = [8, 128], strides = [1, 1]} : vector<8x512xf32> to vector<8x128xf32>
    %224 = arith.negf %223 : vector<8x128xf32>
    %225 = math.exp %224 : vector<8x128xf32>
    %cst_106 = arith.constant 1.000000e+00 : f32
    %226 = vector.broadcast %cst_106 : f32 to vector<8x128xf32>
    %227 = arith.addf %226, %225 : vector<8x128xf32>
    %228 = arith.divf %226, %227 : vector<8x128xf32>
    %c0_107 = arith.constant 0 : index
    %c0_108 = arith.constant 0 : index
    %229 = vector.load %arg13[%c0_107, %c0_108] : memref<8x128xf32, #tpu.memory_space<vmem>>, vector<8x128xf32>
    %230 = arith.mulf %220, %229 : vector<8x128xf32>
    %231 = arith.mulf %214, %222 : vector<8x128xf32>
    %232 = arith.addf %230, %231 : vector<8x128xf32>
    %233 = math.tanh %232 : vector<8x128xf32>
    %234 = arith.mulf %228, %233 : vector<8x128xf32>
    %c0_109 = arith.constant 0 : index
    %c0_110 = arith.constant 0 : index
    %235 = vector.load %arg13[%c0_109, %c0_110] : memref<8x128xf32, #tpu.memory_space<vmem>>, vector<8x128xf32>
    tpu.vector_store %arg13[%c0_109, %c0_110], %232 {strides = array<i32>} : memref<8x128xf32, #tpu.memory_space<vmem>>, vector<8x128xf32>,
    %c0_111 = arith.constant 0 : index
    %c0_112 = arith.constant 0 : index
    %236 = vector.load %arg12[%c0_111, %c0_112] : memref<8x128xf32, #tpu.memory_space<vmem>>, vector<8x128xf32>
    tpu.vector_store %arg12[%c0_111, %c0_112], %234 {strides = array<i32>} : memref<8x128xf32, #tpu.memory_space<vmem>>, vector<8x128xf32>,
    %237 = arith.index_cast %202 : i32 to index
    %c0_113 = arith.constant 0 : index
    %238 = vector.load %arg11[%237, %c0_113] : memref<64x128xf32, #tpu.memory_space<vmem>>, vector<8x128xf32>
    tpu.vector_store %arg11[%237, %c0_113], %234 {strides = array<i32>} : memref<64x128xf32, #tpu.memory_space<vmem>>, vector<8x128xf32>,
    %c6_i32 = arith.constant 6 : i32
    %c8_i32_114 = arith.constant 8 : i32
    %239 = arith.muli %c6_i32, %c8_i32_114 : i32
    %240 = tpu.assume_multiple %239, 8 : i32
    %241 = arith.index_cast %240 : i32 to index
    %c0_115 = arith.constant 0 : index
    %242 = vector.load %arg10[%241, %c0_115] : memref<64x512xf32, #tpu.memory_space<vmem>>, vector<8x512xf32>
    %c0_116 = arith.constant 0 : index
    %c0_117 = arith.constant 0 : index
    %243 = vector.load %arg12[%c0_116, %c0_117] : memref<8x128xf32, #tpu.memory_space<vmem>>, vector<8x128xf32>
    %c0_118 = arith.constant 0 : index
    %c0_119 = arith.constant 0 : index
    %244 = vector.load %arg3[%c0_118, %c0_119] : memref<128x512xf32, #tpu.memory_space<vmem>>, vector<128x512xf32>
    %cst_120 = arith.constant dense<0.000000e+00> : vector<8x512xf32>
    %245 = tpu.matmul %243, %244, %cst_120 {dimension_numbers = #tpu.dot_dimension_numbers<[1], [0], [0], [1], [0, 0, 1, 1], [], []>} : vector<8x128xf32>, vector<128x512xf32>, vector<8x512xf32> -> vector<8x512xf32>
    %246 = arith.addf %242, %245 : vector<8x512xf32>
    %247 = vector.extract_strided_slice %246 {offsets = [0, 0], sizes = [8, 128], strides = [1, 1]} : vector<8x512xf32> to vector<8x128xf32>
    %248 = arith.negf %247 : vector<8x128xf32>
    %249 = math.exp %248 : vector<8x128xf32>
    %cst_121 = arith.constant 1.000000e+00 : f32
    %250 = vector.broadcast %cst_121 : f32 to vector<8x128xf32>
    %251 = arith.addf %250, %249 : vector<8x128xf32>
    %252 = arith.divf %250, %251 : vector<8x128xf32>
    %253 = vector.extract_strided_slice %246 {offsets = [0, 128], sizes = [8, 128], strides = [1, 1]} : vector<8x512xf32> to vector<8x128xf32>
    %254 = arith.negf %253 : vector<8x128xf32>
    %255 = math.exp %254 : vector<8x128xf32>
    %cst_122 = arith.constant 1.000000e+00 : f32
    %256 = vector.broadcast %cst_122 : f32 to vector<8x128xf32>
    %257 = arith.addf %256, %255 : vector<8x128xf32>
    %258 = arith.divf %256, %257 : vector<8x128xf32>
    %259 = vector.extract_strided_slice %246 {offsets = [0, 256], sizes = [8, 128], strides = [1, 1]} : vector<8x512xf32> to vector<8x128xf32>
    %260 = math.tanh %259 : vector<8x128xf32>
    %261 = vector.extract_strided_slice %246 {offsets = [0, 384], sizes = [8, 128], strides = [1, 1]} : vector<8x512xf32> to vector<8x128xf32>
    %262 = arith.negf %261 : vector<8x128xf32>
    %263 = math.exp %262 : vector<8x128xf32>
    %cst_123 = arith.constant 1.000000e+00 : f32
    %264 = vector.broadcast %cst_123 : f32 to vector<8x128xf32>
    %265 = arith.addf %264, %263 : vector<8x128xf32>
    %266 = arith.divf %264, %265 : vector<8x128xf32>
    %c0_124 = arith.constant 0 : index
    %c0_125 = arith.constant 0 : index
    %267 = vector.load %arg13[%c0_124, %c0_125] : memref<8x128xf32, #tpu.memory_space<vmem>>, vector<8x128xf32>
    %268 = arith.mulf %258, %267 : vector<8x128xf32>
    %269 = arith.mulf %252, %260 : vector<8x128xf32>
    %270 = arith.addf %268, %269 : vector<8x128xf32>
    %271 = math.tanh %270 : vector<8x128xf32>
    %272 = arith.mulf %266, %271 : vector<8x128xf32>
    %c0_126 = arith.constant 0 : index
    %c0_127 = arith.constant 0 : index
    %273 = vector.load %arg13[%c0_126, %c0_127] : memref<8x128xf32, #tpu.memory_space<vmem>>, vector<8x128xf32>
    tpu.vector_store %arg13[%c0_126, %c0_127], %270 {strides = array<i32>} : memref<8x128xf32, #tpu.memory_space<vmem>>, vector<8x128xf32>,
    %c0_128 = arith.constant 0 : index
    %c0_129 = arith.constant 0 : index
    %274 = vector.load %arg12[%c0_128, %c0_129] : memref<8x128xf32, #tpu.memory_space<vmem>>, vector<8x128xf32>
    tpu.vector_store %arg12[%c0_128, %c0_129], %272 {strides = array<i32>} : memref<8x128xf32, #tpu.memory_space<vmem>>, vector<8x128xf32>,
    %275 = arith.index_cast %240 : i32 to index
    %c0_130 = arith.constant 0 : index
    %276 = vector.load %arg11[%275, %c0_130] : memref<64x128xf32, #tpu.memory_space<vmem>>, vector<8x128xf32>
    tpu.vector_store %arg11[%275, %c0_130], %272 {strides = array<i32>} : memref<64x128xf32, #tpu.memory_space<vmem>>, vector<8x128xf32>,
    %c7_i32 = arith.constant 7 : i32
    %c8_i32_131 = arith.constant 8 : i32
    %277 = arith.muli %c7_i32, %c8_i32_131 : i32
    %278 = tpu.assume_multiple %277, 8 : i32
    %279 = arith.index_cast %278 : i32 to index
    %c0_132 = arith.constant 0 : index
    %280 = vector.load %arg10[%279, %c0_132] : memref<64x512xf32, #tpu.memory_space<vmem>>, vector<8x512xf32>
    %c0_133 = arith.constant 0 : index
    %c0_134 = arith.constant 0 : index
    %281 = vector.load %arg12[%c0_133, %c0_134] : memref<8x128xf32, #tpu.memory_space<vmem>>, vector<8x128xf32>
    %c0_135 = arith.constant 0 : index
    %c0_136 = arith.constant 0 : index
    %282 = vector.load %arg3[%c0_135, %c0_136] : memref<128x512xf32, #tpu.memory_space<vmem>>, vector<128x512xf32>
    %cst_137 = arith.constant dense<0.000000e+00> : vector<8x512xf32>
    %283 = tpu.matmul %281, %282, %cst_137 {dimension_numbers = #tpu.dot_dimension_numbers<[1], [0], [0], [1], [0, 0, 1, 1], [], []>} : vector<8x128xf32>, vector<128x512xf32>, vector<8x512xf32> -> vector<8x512xf32>
    %284 = arith.addf %280, %283 : vector<8x512xf32>
    %285 = vector.extract_strided_slice %284 {offsets = [0, 0], sizes = [8, 128], strides = [1, 1]} : vector<8x512xf32> to vector<8x128xf32>
    %286 = arith.negf %285 : vector<8x128xf32>
    %287 = math.exp %286 : vector<8x128xf32>
    %cst_138 = arith.constant 1.000000e+00 : f32
    %288 = vector.broadcast %cst_138 : f32 to vector<8x128xf32>
    %289 = arith.addf %288, %287 : vector<8x128xf32>
    %290 = arith.divf %288, %289 : vector<8x128xf32>
    %291 = vector.extract_strided_slice %284 {offsets = [0, 128], sizes = [8, 128], strides = [1, 1]} : vector<8x512xf32> to vector<8x128xf32>
    %292 = arith.negf %291 : vector<8x128xf32>
    %293 = math.exp %292 : vector<8x128xf32>
    %cst_139 = arith.constant 1.000000e+00 : f32
    %294 = vector.broadcast %cst_139 : f32 to vector<8x128xf32>
    %295 = arith.addf %294, %293 : vector<8x128xf32>
    %296 = arith.divf %294, %295 : vector<8x128xf32>
    %297 = vector.extract_strided_slice %284 {offsets = [0, 256], sizes = [8, 128], strides = [1, 1]} : vector<8x512xf32> to vector<8x128xf32>
    %298 = math.tanh %297 : vector<8x128xf32>
    %299 = vector.extract_strided_slice %284 {offsets = [0, 384], sizes = [8, 128], strides = [1, 1]} : vector<8x512xf32> to vector<8x128xf32>
    %300 = arith.negf %299 : vector<8x128xf32>
    %301 = math.exp %300 : vector<8x128xf32>
    %cst_140 = arith.constant 1.000000e+00 : f32
    %302 = vector.broadcast %cst_140 : f32 to vector<8x128xf32>
    %303 = arith.addf %302, %301 : vector<8x128xf32>
    %304 = arith.divf %302, %303 : vector<8x128xf32>
    %c0_141 = arith.constant 0 : index
    %c0_142 = arith.constant 0 : index
    %305 = vector.load %arg13[%c0_141, %c0_142] : memref<8x128xf32, #tpu.memory_space<vmem>>, vector<8x128xf32>
    %306 = arith.mulf %296, %305 : vector<8x128xf32>
    %307 = arith.mulf %290, %298 : vector<8x128xf32>
    %308 = arith.addf %306, %307 : vector<8x128xf32>
    %309 = math.tanh %308 : vector<8x128xf32>
    %310 = arith.mulf %304, %309 : vector<8x128xf32>
    %c0_143 = arith.constant 0 : index
    %c0_144 = arith.constant 0 : index
    %311 = vector.load %arg13[%c0_143, %c0_144] : memref<8x128xf32, #tpu.memory_space<vmem>>, vector<8x128xf32>
    tpu.vector_store %arg13[%c0_143, %c0_144], %308 {strides = array<i32>} : memref<8x128xf32, #tpu.memory_space<vmem>>, vector<8x128xf32>,
    %c0_145 = arith.constant 0 : index
    %c0_146 = arith.constant 0 : index
    %312 = vector.load %arg12[%c0_145, %c0_146] : memref<8x128xf32, #tpu.memory_space<vmem>>, vector<8x128xf32>
    tpu.vector_store %arg12[%c0_145, %c0_146], %310 {strides = array<i32>} : memref<8x128xf32, #tpu.memory_space<vmem>>, vector<8x128xf32>,
    %313 = arith.index_cast %278 : i32 to index
    %c0_147 = arith.constant 0 : index
    %314 = vector.load %arg11[%313, %c0_147] : memref<64x128xf32, #tpu.memory_space<vmem>>, vector<8x128xf32>
    tpu.vector_store %arg11[%313, %c0_147], %310 {strides = array<i32>} : memref<64x128xf32, #tpu.memory_space<vmem>>, vector<8x128xf32>,
    %c8_i32_148 = arith.constant 8 : i32
    %c0_149 = arith.constant 0 : index
    %c0_150 = arith.constant 0 : index
    %315 = vector.load %arg11[%c0_149, %c0_150] : memref<64x128xf32, #tpu.memory_space<vmem>>, vector<64x128xf32>
    %c0_151 = arith.constant 0 : index
    %c0_152 = arith.constant 0 : index
    %316 = vector.load %arg5[%c0_151, %c0_152] : memref<128x128xf32, #tpu.memory_space<vmem>>, vector<128x128xf32>
    %cst_153 = arith.constant dense<0.000000e+00> : vector<64x128xf32>
    %317 = tpu.matmul %315, %316, %cst_153 {dimension_numbers = #tpu.dot_dimension_numbers<[1], [0], [0], [1], [0, 0, 1, 1], [], []>} : vector<64x128xf32>, vector<128x128xf32>, vector<64x128xf32> -> vector<64x128xf32>
    %c0_154 = arith.constant 0 : index
    %c0_155 = arith.constant 0 : index
    %318 = vector.load %arg6[%c0_154, %c0_155] : memref<1x128xf32, #tpu.memory_space<vmem>>, vector<1x128xf32>
    %319 = vector.broadcast %318 : vector<1x128xf32> to vector<64x128xf32>
    %320 = arith.addf %317, %319 : vector<64x128xf32>
    %cst_156 = arith.constant dense<0xFF800000> : vector<64xf32>
    %321 = vector.multi_reduction <maximumf>, %320, %cst_156 [1] : vector<64x128xf32> to vector<64xf32>
    %322 = vector.shape_cast %321 : vector<64xf32> to vector<64x1xf32>
    %323 = vector.broadcast %322 : vector<64x1xf32> to vector<64x128xf32>
    %324 = arith.subf %320, %323 : vector<64x128xf32>
    %325 = math.exp %324 : vector<64x128xf32>
    %cst_157 = arith.constant dense<0.000000e+00> : vector<64xf32>
    %326 = vector.multi_reduction <add>, %325, %cst_157 [1] : vector<64x128xf32> to vector<64xf32>
    %327 = vector.shape_cast %326 : vector<64xf32> to vector<64x1xf32>
    %328 = math.log %327 : vector<64x1xf32>
    %329 = arith.addf %328, %322 : vector<64x1xf32>
    %330 = vector.broadcast %329 : vector<64x1xf32> to vector<64x128xf32>
    %331 = arith.subf %320, %330 : vector<64x128xf32>
    %c0_158 = arith.constant 0 : index
    %c0_159 = arith.constant 0 : index
    %332 = vector.load %arg7[%c0_158, %c0_159] : memref<64x128xf32, #tpu.memory_space<vmem>>, vector<64x128xf32>
    tpu.vector_store %arg7[%c0_158, %c0_159], %331 {strides = array<i32>} : memref<64x128xf32, #tpu.memory_space<vmem>>, vector<64x128xf32>,
    %c0_160 = arith.constant 0 : index
    %c0_161 = arith.constant 0 : index
    %333 = vector.load %arg12[%c0_160, %c0_161] : memref<8x128xf32, #tpu.memory_space<vmem>>, vector<8x128xf32>
    %c0_162 = arith.constant 0 : index
    %c0_163 = arith.constant 0 : index
    %334 = vector.load %arg8[%c0_162, %c0_163] : memref<8x128xf32, #tpu.memory_space<vmem>>, vector<8x128xf32>
    tpu.vector_store %arg8[%c0_162, %c0_163], %333 {strides = array<i32>} : memref<8x128xf32, #tpu.memory_space<vmem>>, vector<8x128xf32>,
    %c0_164 = arith.constant 0 : index
    %c0_165 = arith.constant 0 : index
    %335 = vector.load %arg13[%c0_164, %c0_165] : memref<8x128xf32, #tpu.memory_space<vmem>>, vector<8x128xf32>
    %c0_166 = arith.constant 0 : index
    %c0_167 = arith.constant 0 : index
    %336 = vector.load %arg9[%c0_166, %c0_167] : memref<8x128xf32, #tpu.memory_space<vmem>>, vector<8x128xf32>
    tpu.vector_store %arg9[%c0_166, %c0_167], %335 {strides = array<i32>} : memref<8x128xf32, #tpu.memory_space<vmem>>, vector<8x128xf32>,
    return
  }
  func.func @transform_0(%arg0: i32) -> (i32, i32) {
    %c0_i32 = arith.constant 0 : i32
    %c0_i32_0 = arith.constant 0 : i32
    %c0_i32_1 = arith.constant 0 : i32
    return %c0_i32, %c0_i32_0 : i32, i32
  }
  func.func @transform_1(%arg0: i32) -> (i32, i32) {
    %c0_i32 = arith.constant 0 : i32
    %c0_i32_0 = arith.constant 0 : i32
    %c0_i32_1 = arith.constant 0 : i32
    return %c0_i32, %c0_i32_0 : i32, i32
  }
  func.func @transform_2(%arg0: i32) -> (i32, i32) {
    %c0_i32 = arith.constant 0 : i32
    %c0_i32_0 = arith.constant 0 : i32
    %c0_i32_1 = arith.constant 0 : i32
    return %c0_i32, %c0_i32_0 : i32, i32
  }
  func.func @transform_3(%arg0: i32) -> (i32, i32) {
    %c0_i32 = arith.constant 0 : i32
    %c0_i32_0 = arith.constant 0 : i32
    %c0_i32_1 = arith.constant 0 : i32
    return %c0_i32, %c0_i32_0 : i32, i32
  }
  func.func @transform_4(%arg0: i32) -> (i32, i32) {
    %c0_i32 = arith.constant 0 : i32
    %c0_i32_0 = arith.constant 0 : i32
    %c0_i32_1 = arith.constant 0 : i32
    return %c0_i32, %c0_i32_0 : i32, i32
  }
  func.func @transform_5(%arg0: i32) -> (i32, i32) {
    %c0_i32 = arith.constant 0 : i32
    %c0_i32_0 = arith.constant 0 : i32
    %c0_i32_1 = arith.constant 0 : i32
    return %c0_i32, %c0_i32_0 : i32, i32
  }
  func.func @transform_6(%arg0: i32) -> (i32, i32) {
    %c0_i32 = arith.constant 0 : i32
    %c0_i32_0 = arith.constant 0 : i32
    %c0_i32_1 = arith.constant 0 : i32
    return %c0_i32, %c0_i32_0 : i32, i32
  }
  func.func @transform_7(%arg0: i32) -> (i32, i32) {
    %c0_i32 = arith.constant 0 : i32
    %c0_i32_0 = arith.constant 0 : i32
    %c0_i32_1 = arith.constant 0 : i32
    return %c0_i32, %c0_i32_0 : i32, i32
  }
  func.func @transform_8(%arg0: i32) -> (i32, i32) {
    %c0_i32 = arith.constant 0 : i32
    %c0_i32_0 = arith.constant 0 : i32
    %c0_i32_1 = arith.constant 0 : i32
    return %c0_i32, %c0_i32_0 : i32, i32
  }
}

</mosaic_0001>

<bundles_post_ra>
// kernel: tpu_custom_call.1
= control target key start
LH: loop header
LB: loop body
LE: loop exit
PB: predicated region body
PF: predicated region fallthrough
CT: control target
= control target key end

     0   :  { %14 = vsyncpa [#allocation7], 0  ;;  %s4674_s0 = inlined_call_operand.hbm [shape: f32[64,64], index: 0, kind: input, shape index: {}]   ;;  %s4675_s1 = inlined_call_operand.hbm [shape: f32[64,512], index: 1, kind: input, shape index: {}]   ;;  %s4676_s2 = inlined_call_operand.hbm [shape: f32[128,512], index: 2, kind: input, shape index: {}]   ;;  %s4677_s3 = inlined_call_operand.hbm [shape: f32[1,512], index: 3, kind: input, shape index: {}]   ;;  %s4678_s4 = inlined_call_operand.hbm [shape: f32[128,128], index: 4, kind: input, shape index: {}]   ;;  %s4679_s5 = inlined_call_operand.hbm [shape: f32[1,128], index: 5, kind: input, shape index: {}]   ;;  %s4680_s6 = inlined_call_operand.hbm [shape: f32[64,128], index: 6, kind: output, shape index: {0}]   ;;  %s4681_s7 = inlined_call_operand.hbm [shape: f32[8,128], index: 7, kind: output, shape index: {1}]   ;;  %s4682_s8 = inlined_call_operand.hbm [shape: f32[8,128], index: 8, kind: output, shape index: {2}]  }
   0x1   :  { %15 = vsyncpa [#allocation10], 0 }
   0x2   :  { %16 = vsyncpa [#allocation13], 0 }
   0x3   :  { %17 = vsyncpa [#allocation16], 0 }
   0x4   :  { %18 = vsyncpa [#allocation8], 0 }
   0x5   :  { %19 = vsyncpa [#allocation19], 0  ;;  %s3851_s27 = smov [#allocation9]   ;;  %s3641_s9 = scalar_lea.hbm %s4675_s1, 4096 }
   0x6   :  { %s37_s28 = sshll.u32 %s3851_s27, 4  ;;  %p3642_p0 = scmp.ne.s32.totalorder %s4675_s1, %s3641_s9  ;;  %s38_s28 = int_to_ptr.vmem [resolvable:$true] %s37_s28 }
   0x7   :  { %p3645_p1 = scmp.lt.u32.totalorder %s3641_s9, %s4675_s1 }
   0x9   :  { %p3647_p2 = pnand %p3645_p1, %p3642_p0 }
   0xb   :  { %3650 = shalt.err (!%p3647_p2)
}
   0xc   :  { %s3651_s14 = scalar_lea.vmem %s38_s28, 4096  ;;  %p3656_p4 = scmp.lt.s32.totalorder %s38_s28, %s38_s28 }
   0xd   :  { %p3652_p3 = scmp.ne.s32.totalorder %s38_s28, %s3651_s14  ;;  %p3657_p5 = scmp.lt.s32.totalorder %s3651_s14, %s3651_s14 }
   0xf   :  { %p3658_p6 = por %p3657_p5, %p3656_p4 }
  0x11   :  { %p3659_p7 = pnand %p3658_p6, %p3652_p3 }
  0x13   :  { %3662 = shalt.err (!%p3659_p7)
}
  0x14   :  { %s3852_s15 = smov 512   ;;  %s3853_s16 = smov 32  }
  0x15   :  { %43 = dma.hbm_to_vmem [thread:$0]  %s4675_s1, 4096, %s38_s28, [#allocation10], %s3852_s15, %s3852_s15, %s3853_s16  }
  0x16   :  { %s3854_s19 = smov [#allocation12]   ;;  %s3855_s21 = smov [#allocation6]  }
  0x17   :  { %s62_s20 = sshll.u32 %s3854_s19, 4  ;;  %s25_s22 = sshll.u32 %s3855_s21, 4  ;;  %s63_s20 = int_to_ptr.vmem [resolvable:$true] %s62_s20  ;;  %s26_s22 = int_to_ptr.vmem [resolvable:$true] %s25_s22 }
  0x18   :  { %s3663_s25 = scalar_lea.hbm %s4677_s3, 64 }
  0x19   :  { %p3664_p8 = scmp.ne.s32.totalorder %s4677_s3, %s3663_s25  ;;  %p3667_p9 = scmp.lt.u32.totalorder %s3663_s25, %s4677_s3 }
  0x1b   :  { %p3669_p10 = pnand %p3667_p9, %p3664_p8 }
  0x1d   :  { %3672 = shalt.err (!%p3669_p10)
}
  0x1e   :  { %s3673_s1 = scalar_lea.vmem %s63_s20, 64  ;;  %p3678_p12 = scmp.lt.s32.totalorder %s63_s20, %s63_s20 }
  0x1f   :  { %p3674_p11 = scmp.ne.s32.totalorder %s63_s20, %s3673_s1  ;;  %p3679_p13 = scmp.lt.s32.totalorder %s3673_s1, %s3673_s1 }
  0x21   :  { %p3680_p0 = por %p3679_p13, %p3678_p12 }
  0x23   :  { %p3681_p1 = pnand %p3680_p0, %p3674_p11 }
  0x25   :  { %3684 = shalt.err (!%p3681_p1)
}
  0x26   :  { %65 = dma.hbm_to_vmem [thread:$0]  %s4677_s3, 64, %s63_s20, [#allocation13]  }
  0x27   :  { %s3685_s12 = scalar_lea.hbm %s4674_s0, 1024 }
  0x28   :  { %p3686_p2 = scmp.ne.s32.totalorder %s4674_s0, %s3685_s12  ;;  %p3689_p3 = scmp.lt.u32.totalorder %s3685_s12, %s4674_s0 }
  0x2a   :  { %p3691_p4 = pnand %p3689_p3, %p3686_p2 }
  0x2c   :  { %3694 = shalt.err (!%p3691_p4)
}
  0x2d   :  { %s3695_s19 = scalar_lea.vmem %s26_s22, 1024  ;;  %p3700_p6 = scmp.lt.s32.totalorder %s26_s22, %s26_s22 }
  0x2e   :  { %p3696_p5 = scmp.ne.s32.totalorder %s26_s22, %s3695_s19  ;;  %p3701_p7 = scmp.lt.s32.totalorder %s3695_s19, %s3695_s19 }
  0x30   :  { %p3702_p8 = por %p3701_p7, %p3700_p6 }
  0x32   :  { %p3703_p9 = pnand %p3702_p8, %p3696_p5 }
  0x34   :  { %3706 = shalt.err (!%p3703_p9)
}
  0x35   :  { %s3856_s3 = smov 128   ;;  %s3857_s20 = smov 8  }
  0x36   :  { %31 = dma.hbm_to_vmem [thread:$0]  %s4674_s0, 1024, %s26_s22, [#allocation7], %s3856_s3, %s3856_s3, %s3857_s20  }
  0x37   :  { %s3858_s24 = smov [#allocation11]   ;;  %s3859_s26 = smov [#allocation14]  }
  0x38   :  { %s49_s25 = sshll.u32 %s3858_s24, 4  ;;  %s71_s27 = sshll.u32 %s3859_s26, 4  ;;  %s50_s25 = int_to_ptr.vmem [resolvable:$true] %s49_s25  ;;  %s72_s27 = int_to_ptr.vmem [resolvable:$true] %s71_s27 }
  0x39   :  { %s3707_s1 = scalar_lea.hbm %s4676_s2, 8192 }
  0x3a   :  { %p3708_p10 = scmp.ne.s32.totalorder %s4676_s2, %s3707_s1  ;;  %p3711_p11 = scmp.lt.u32.totalorder %s3707_s1, %s4676_s2 }
  0x3c   :  { %p3713_p12 = pnand %p3711_p11, %p3708_p10 }
  0x3e   :  { %3716 = shalt.err (!%p3713_p12)
}
  0x3f   :  { %s3717_s0 = scalar_lea.vmem %s50_s25, 8192  ;;  %p3722_p0 = scmp.lt.s32.totalorder %s50_s25, %s50_s25 }
  0x40   :  { %p3718_p13 = scmp.ne.s32.totalorder %s50_s25, %s3717_s0  ;;  %p3723_p1 = scmp.lt.s32.totalorder %s3717_s0, %s3717_s0 }
  0x42   :  { %p3724_p2 = por %p3723_p1, %p3722_p0 }
  0x44   :  { %p3725_p3 = pnand %p3724_p2, %p3718_p13 }
  0x46   :  { %3728 = shalt.err (!%p3725_p3)
}
  0x47   :  { %55 = dma.hbm_to_vmem [thread:$0]  %s4676_s2, 8192, %s50_s25, [#allocation10], %s3852_s15, %s3852_s15, %s3853_s16  }
  0x48   :  { %s3729_s17 = scalar_lea.hbm %s4678_s4, 2048 }
  0x49   :  { %p3730_p4 = scmp.ne.s32.totalorder %s4678_s4, %s3729_s17  ;;  %p3733_p5 = scmp.lt.u32.totalorder %s3729_s17, %s4678_s4 }
  0x4b   :  { %p3735_p6 = pnand %p3733_p5, %p3730_p4 }
  0x4d   :  { %3738 = shalt.err (!%p3735_p6)
}
  0x4e   :  { %s3739_s24 = scalar_lea.vmem %s72_s27, 2048  ;;  %p3744_p8 = scmp.lt.s32.totalorder %s72_s27, %s72_s27 }
  0x4f   :  { %p3740_p7 = scmp.ne.s32.totalorder %s72_s27, %s3739_s24  ;;  %p3745_p9 = scmp.lt.s32.totalorder %s3739_s24, %s3739_s24 }
  0x51   :  { %p3746_p10 = por %p3745_p9, %p3744_p8 }
  0x53   :  { %p3747_p11 = pnand %p3746_p10, %p3740_p7 }
  0x55   :  { %3750 = shalt.err (!%p3747_p11)
}
  0x56   :  { %77 = dma.hbm_to_vmem [thread:$0]  %s4678_s4, 2048, %s72_s27, [#allocation13], %s3856_s3, %s3856_s3, %s3857_s20  }
  0x57   :  { %s3860_s16 = smov [#allocation15]   ;;  %s3751_s30 = scalar_lea.hbm %s4679_s5, 16 }
  0x58   :  { %s84_s25 = sshll.u32 %s3860_s16, 4  ;;  %p3752_p12 = scmp.ne.s32.totalorder %s4679_s5, %s3751_s30  ;;  %s85_s25 = int_to_ptr.vmem [resolvable:$true] %s84_s25 }
  0x59   :  { %p3755_p13 = scmp.lt.u32.totalorder %s3751_s30, %s4679_s5 }
  0x5b   :  { %p3757_p0 = pnand %p3755_p13, %p3752_p12 }
  0x5d   :  { %3760 = shalt.err (!%p3757_p0)
}
  0x5e   :  { %s3761_s11 = scalar_lea.vmem %s85_s25, 16  ;;  %s3765_s4 = scalar_lea.vmem %s85_s25, 32 }
  0x5f   :  { %p3762_p1 = scmp.ne.s32.totalorder %s85_s25, %s3761_s11  ;;  %p3766_p2 = scmp.lt.s32.totalorder %s85_s25, %s85_s25 }
  0x60   :  { %p3767_p3 = scmp.lt.s32.totalorder %s3765_s4, %s3761_s11 }
  0x62   :  { %p3768_p4 = por %p3767_p3, %p3766_p2 }
  0x64   :  { %p3769_p5 = pnand %p3768_p4, %p3762_p1 }
  0x66   :  { %3772 = shalt.err (!%p3769_p5)
}
  0x67   :  { %87 = dma.hbm_to_vmem [thread:$0]  %s4679_s5, 16, %s85_s25, [#allocation16]  }
  0x68   :  { %3839 = dma.done.wait [#allocation7], 1024  }
  0x69   :  { %3840 = vsyncadd [#allocation7], 4294966272 }
  0x6a   :  { %3841 = dma.done.wait [#allocation10], 12288  }
  0x6b   :  { %3842 = vsyncadd [#allocation10], 4294955008 }
  0x6c   :  { %3843 = dma.done.wait [#allocation13], 2112  }
  0x6d   :  { %3844 = vsyncadd [#allocation13], 4294965184 }
  0x6e   :  { %3845 = dma.done.wait [#allocation16], 16  }
  0x6f   :  { %3846 = vsyncadd [#allocation16], 4294967280  ;;  %v4683_v0 = vmov 0.0   ;;  %v115_v1 = vld [vmem:[#allocation9 + $0x8] sm:$0xff]  ;;  %v114_v6 = vld [vmem:[#allocation9] sm:$0xff]  ;;  %vm168_vm0 = vcmask 523264  }
  0x70   :  { %257 = vmatprep.mubr.f32.mxu1 %v4683_v0  ;;  %589 = vmatprep.mubr.f32.mxu0 %v4683_v0  ;;  %v119_v2 = vld [vmem:[#allocation9 + $0x28] sm:$0xff]  ;;  %v118_v7 = vld [vmem:[#allocation9 + $0x20] sm:$0xff]  ;;  %v117_v47 = vld [vmem:[#allocation9 + $0x18] sm:$0xff]  ;;  %s3862_s5 = smov [#allocation18]  }
  0x71   :  { %v462_v3 = vld [vmem:[#allocation11 + $0x8] sm:$0xff]  ;;  %v2827_v4 = vpack.c.bf16 %v119_v2, %v115_v1  ;;  %v2829_v9 = vpack.c.bf16 %v118_v7, %v114_v6  ;;  %v461_v10 = vld [vmem:[#allocation11] sm:$0xff]  ;;  %v121_v48 = vld [vmem:[#allocation9 + $0x38] sm:$0xff]  ;;  %s2682_s22 = sshll.u32 %s3862_s5, 4  ;;  %s2683_s22 = int_to_ptr.vmem [resolvable:$true] %s2682_s22 }
  0x72   :  { %v466_v5 = vld [vmem:[#allocation11 + $0x28] sm:$0xff]  ;;  %v465_v11 = vld [vmem:[#allocation11 + $0x20] sm:$0xff]  ;;  %v2843_v53 = vpack.c.bf16 %v121_v48, %v117_v47  ;;  %v116_v54 = vld [vmem:[#allocation9 + $0x10] sm:$0xff]  ;;  %s3773_s12 = scalar_lea.vmem %s2683_s22, 128  ;;  %p3778_p7 = scmp.lt.s32.totalorder %s2683_s22, %s2683_s22 }
  0x73   :  { %v3996_v8 = vpack.c.bf16 %v466_v5, %v462_v3  ;;  %v123_v12 = vld [vmem:[#allocation9 + $0x48] sm:$0xff]  ;;  %2828 = vmatprep.subr.bf16.mxu1 %v2827_v4  ;;  %v3998_v13 = vpack.c.bf16 %v465_v11, %v461_v10  ;;  %v122_v19 = vld [vmem:[#allocation9 + $0x40] sm:$0xff]  ;;  %v120_v55 = vld [vmem:[#allocation9 + $0x30] sm:$0xff]  ;;  %p3774_p6 = scmp.ne.s32.totalorder %s2683_s22, %s3773_s12  ;;  %p3779_p8 = scmp.lt.s32.totalorder %s3773_s12, %s3773_s12 }
  0x74   :  { %v127_v14 = vld [vmem:[#allocation9 + $0x68] sm:$0xff]  ;;  %2830 = vmatpush1.bf16.msra.mxu1 %v2829_v9  ;;  %v126_v20 = vld [vmem:[#allocation9 + $0x60] sm:$0xff]  ;;  %v125_v61 = vld [vmem:[#allocation9 + $0x58] sm:$0xff]  ;;  %v2845_v63 = vpack.c.bf16 %v120_v55, %v116_v54 }
  0x75   :  { %v470_v15 = vld [vmem:[#allocation11 + $0x48] sm:$0xff]  ;;  %2860 = vmatprep.subr.bf16.mxu0 %v3996_v8  ;;  %v2831_v17 = vpack.c.bf16 %v127_v14, %v123_v12  ;;  %v469_v21 = vld [vmem:[#allocation11 + $0x40] sm:$0xff]  ;;  %v2833_v22 = vpack.c.bf16 %v126_v20, %v122_v19  ;;  %v129_v1 = vld [vmem:[#allocation9 + $0x78] sm:$0xff]  ;;  %p3780_p9 = por %p3779_p8, %p3778_p7 }
  0x76   :  { %v474_v16 = vld [vmem:[#allocation11 + $0x68] sm:$0xff]  ;;  %2862 = vmatpush1.bf16.msra.mxu0 %v3998_v13  ;;  %v473_v23 = vld [vmem:[#allocation11 + $0x60] sm:$0xff]  ;;  %v2847_v3 = vpack.c.bf16 %v129_v1, %v125_v61  ;;  %v124_v4 = vld [vmem:[#allocation9 + $0x50] sm:$0xff] }
  0x77   :  { %v4001_v18 = vpack.c.bf16 %v474_v16, %v470_v15  ;;  %v131_v24 = vld [vmem:[#allocation9 + $0x88] sm:$0xff]  ;;  %2832 = vmatprep.subr.bf16.mxu1 %v2831_v17  ;;  %v4005_v26 = vpack.c.bf16 %v473_v23, %v469_v21  ;;  %v130_v30 = vld [vmem:[#allocation9 + $0x80] sm:$0xff]  ;;  %v128_v5 = vld [vmem:[#allocation9 + $0x70] sm:$0xff]  ;;  %p3781_p10 = pnand %p3780_p9, %p3774_p6 }
  0x78   :  { %v135_v25 = vld [vmem:[#allocation9 + $0xa8] sm:$0xff]  ;;  %v134_v32 = vld [vmem:[#allocation9 + $0xa0] sm:$0xff]  ;;  %2834 = vmatpush1.bf16.msra.mxu1 %v2833_v22  ;;  %v2849_v14 = vpack.c.bf16 %v128_v5, %v124_v4  ;;  %v133_v15 = vld [vmem:[#allocation9 + $0x98] sm:$0xff] }
  0x79   :  { %2864 = vmatprep.subr.bf16.mxu0 %v4001_v18  ;;  %v2835_v27 = vpack.c.bf16 %v135_v25, %v131_v24  ;;  %v478_v28 = vld [vmem:[#allocation11 + $0x88] sm:$0xff]  ;;  %v477_v33 = vld [vmem:[#allocation11 + $0x80] sm:$0xff]  ;;  %v2837_v35 = vpack.c.bf16 %v134_v32, %v130_v30  ;;  %v137_v16 = vld [vmem:[#allocation9 + $0xb8] sm:$0xff] }
  0x7a   :  { %v482_v29 = vld [vmem:[#allocation11 + $0xa8] sm:$0xff]  ;;  %v481_v34 = vld [vmem:[#allocation11 + $0xa0] sm:$0xff]  ;;  %2866 = vmatpush1.bf16.msra.mxu0 %v4005_v26  ;;  %v2851_v20 = vpack.c.bf16 %v137_v16, %v133_v15  ;;  %v132_v21 = vld [vmem:[#allocation9 + $0x90] sm:$0xff] }
  0x7b   :  { %v4007_v31 = vpack.c.bf16 %v482_v29, %v478_v28  ;;  %v139_v36 = vld [vmem:[#allocation9 + $0xc8] sm:$0xff]  ;;  %2836 = vmatprep.subr.bf16.mxu1 %v2835_v27  ;;  %v4010_v39 = vpack.c.bf16 %v481_v34, %v477_v33  ;;  %v138_v42 = vld [vmem:[#allocation9 + $0xc0] sm:$0xff]  ;;  %v136_v22 = vld [vmem:[#allocation9 + $0xb0] sm:$0xff] }
  0x7c   :  { %v143_v37 = vld [vmem:[#allocation9 + $0xe8] sm:$0xff]  ;;  %v142_v43 = vld [vmem:[#allocation9 + $0xe0] sm:$0xff]  ;;  %2838 = vmatpush1.bf16.msra.mxu1 %v2837_v35  ;;  %v141_v25 = vld [vmem:[#allocation9 + $0xd8] sm:$0xff]  ;;  %v2853_v32 = vpack.c.bf16 %v136_v22, %v132_v21 }
  0x7d   :  { %v486_v38 = vld [vmem:[#allocation11 + $0xc8] sm:$0xff]  ;;  %v2839_v40 = vpack.c.bf16 %v143_v37, %v139_v36  ;;  %2868 = vmatprep.subr.bf16.mxu0 %v4007_v31  ;;  %v485_v45 = vld [vmem:[#allocation11 + $0xc0] sm:$0xff]  ;;  %v2841_v50 = vpack.c.bf16 %v142_v43, %v138_v42  ;;  %v145_v27 = vld [vmem:[#allocation9 + $0xf8] sm:$0xff] }
  0x7e   :  { %v490_v41 = vld [vmem:[#allocation11 + $0xe8] sm:$0xff]  ;;  %v489_v46 = vld [vmem:[#allocation11 + $0xe0] sm:$0xff]  ;;  %2870 = vmatpush1.bf16.msra.mxu0 %v4010_v39  ;;  %v4043_v30 = vld [vmem:[#allocation6 + $0x10] sm:$0xff]  ;;  %v2855_v35 = vpack.c.bf16 %v145_v27, %v141_v25 }
  0x7f   :  { %v4013_v44 = vpack.c.bf16 %v490_v41, %v486_v38  ;;  %v494_v49 = vld [vmem:[#allocation11 + $0x108] sm:$0xff]  ;;  %2840 = vmatprep.subr.bf16.mxu1 %v2839_v40  ;;  %v4016_v52 = vpack.c.bf16 %v489_v46, %v485_v45  ;;  %v493_v57 = vld [vmem:[#allocation11 + $0x100] sm:$0xff]  ;;  %v140_v36 = vld [vmem:[#allocation9 + $0xd0] sm:$0xff] }
  0x80   :  { %v498_v51 = vld [vmem:[#allocation11 + $0x128] sm:$0xff]  ;;  %v497_v58 = vld [vmem:[#allocation11 + $0x120] sm:$0xff]  ;;  %2842 = vmatpush1.bf16.msra.mxu1 %v2841_v50  ;;  %v144_v37 = vld [vmem:[#allocation9 + $0xf0] sm:$0xff] }
  0x81   :  { %2872 = vmatprep.subr.bf16.mxu0 %v4013_v44  ;;  %v4019_v56 = vpack.c.bf16 %v498_v51, %v494_v49  ;;  %v502_v59 = vld [vmem:[#allocation11 + $0x148] sm:$0xff]  ;;  %v4021_v62 = vld [vmem:[#allocation6] sm:$0xff]  ;;  %2844 = vmatprep.subr.bf16.mxu1 %v2843_v53  ;;  %v4024_v2 = vpack.c.bf16 %v497_v58, %v493_v57  ;;  %v464_v41 = vld [vmem:[#allocation11 + $0x18] sm:$0xff]  ;;  %v2857_v45 = vpack.c.bf16 %v144_v37, %v140_v36 }
  0x82   :  { %v506_v60 = vld [vmem:[#allocation11 + $0x168] sm:$0xff]  ;;  %2874 = vmatpush1.bf16.msra.mxu0 %v4016_v52  ;;  %v501_v7 = vld [vmem:[#allocation11 + $0x140] sm:$0xff]  ;;  %v468_v42 = vld [vmem:[#allocation11 + $0x38] sm:$0xff] }
  0x83   :  { %2876 = vmatprep.subr.bf16.mxu0 %v4019_v56  ;;  %v4027_v6 = vpack.c.bf16 %v506_v60, %v502_v59  ;;  %v505_v9 = vld [vmem:[#allocation11 + $0x160] sm:$0xff]  ;;  %2718 = vmatmul.mubr.msk.f32.vlgmr.msra.gmra.mrb[0].mxu1 %vm168_vm0, %v4021_v62  ;;  %v510_v10 = vld [vmem:[#allocation11 + $0x188] sm:$0xff]  ;;  %v4054_v43 = vld [vmem:[#allocation6 + $0x18] sm:$0xff]  ;;  %v4059_v47 = vpack.c.bf16 %v468_v42, %v464_v41 }
  0x84   :  { %v514_v11 = vld [vmem:[#allocation11 + $0x1a8] sm:$0xff]  ;;  %2846 = vmatpush1.bf16.msra.mxu1 %v2845_v63  ;;  %263 = vmatprep.mubr.f32.mxu1 %v4683_v0  ;;  %v4035_v17 = vpack.c.bf16 %v505_v9, %v501_v7  ;;  %v509_v19 = vld [vmem:[#allocation11 + $0x180] sm:$0xff]  ;;  %v4082_v50 = vld [vmem:[#allocation6 + $0x30] sm:$0xff] }
  0x85   :  { %v4032_v12 = vld [vmem:[#allocation6 + $0x8] sm:$0xff]  ;;  %2848 = vmatprep.subr.bf16.mxu1 %v2847_v3  ;;  %v4038_v23 = vpack.c.bf16 %v514_v11, %v510_v10  ;;  %v513_v24 = vld [vmem:[#allocation11 + $0x1a0] sm:$0xff]  ;;  %v4089_v51 = vld [vmem:[#allocation6 + $0x38] sm:$0xff] }
  0x86   :  { %2878 = vmatpush1.bf16.msra.mxu0 %v4024_v2  ;;  %v518_v28 = vld [vmem:[#allocation11 + $0x1c8] sm:$0xff]  ;;  %v4046_v33 = vpack.c.bf16 %v513_v24, %v509_v19  ;;  %v517_v34 = vld [vmem:[#allocation11 + $0x1c0] sm:$0xff]  ;;  %v463_v53 = vld [vmem:[#allocation11 + $0x10] sm:$0xff] }
  0x87   :  { %2880 = vmatprep.subr.bf16.mxu0 %v4027_v6  ;;  %2719 = vmatmul.mubr.msk.f32.gmra.mrb[2].mxu1 %vm168_vm0, %v4032_v12  ;;  %v522_v29 = vld [vmem:[#allocation11 + $0x1e8] sm:$0xff]  ;;  %v521_v40 = vld [vmem:[#allocation11 + $0x1e0] sm:$0xff]  ;;  %v467_v54 = vld [vmem:[#allocation11 + $0x30] sm:$0xff] }
  0x88   :  { %269 = vmatprep.mubr.f32.mxu1 %v4683_v0  ;;  %2850 = vmatpush1.bf16.msra.mxu1 %v2849_v14  ;;  %v4049_v38 = vpack.c.bf16 %v522_v29, %v518_v28  ;;  %v4057_v46 = vpack.c.bf16 %v521_v40, %v517_v34  ;;  %v4065_v48 = vld [vmem:[#allocation6 + $0x20] sm:$0xff]  ;;  %v4074_v49 = vld [vmem:[#allocation6 + $0x28] sm:$0xff]  ;;  %v472_v55 = vld [vmem:[#allocation11 + $0x58] sm:$0xff]  ;;  %v4096_v58 = vpack.c.bf16 %v467_v54, %v463_v53 }
  0x89   :  { %2852 = vmatprep.subr.bf16.mxu1 %v2851_v20  ;;  %v476_v57 = vld [vmem:[#allocation11 + $0x78] sm:$0xff]  ;;  %v471_v60 = vld [vmem:[#allocation11 + $0x50] sm:$0xff]  ;;  %v146_v54 = vld [vmem:[#allocation12] sm:$0xf] }
  0x8a   :  { %2882 = vmatpush1.bf16.msra.mxu0 %v4035_v17  ;;  %v4098_v59 = vpack.c.bf16 %v476_v57, %v472_v55  ;;  %v475_v61 = vld [vmem:[#allocation11 + $0x70] sm:$0xff]  ;;  %v480_v63 = vld [vmem:[#allocation11 + $0x98] sm:$0xff] }
  0x8b   :  { %2884 = vmatprep.subr.bf16.mxu0 %v4038_v23  ;;  %2720 = vmatmul.mubr.msk.f32.gmra.mrb[4].mxu1 %vm168_vm0, %v4043_v30  ;;  %v484_v1 = vld [vmem:[#allocation11 + $0xb8] sm:$0xff]  ;;  %v4106_v3 = vpack.c.bf16 %v475_v61, %v471_v60  ;;  %v479_v5 = vld [vmem:[#allocation11 + $0x90] sm:$0xff] }
  0x8c   :  { %275 = vmatprep.mubr.f32.mxu1 %v4683_v0  ;;  %2854 = vmatpush1.bf16.msra.mxu1 %v2853_v32  ;;  %v4109_v4 = vpack.c.bf16 %v484_v1, %v480_v63  ;;  %v483_v7 = vld [vmem:[#allocation11 + $0xb0] sm:$0xff]  ;;  %v488_v9 = vld [vmem:[#allocation11 + $0xd8] sm:$0xff] }
  0x8d   :  { %2856 = vmatprep.subr.bf16.mxu1 %v2855_v35  ;;  %v492_v10 = vld [vmem:[#allocation11 + $0xf8] sm:$0xff]  ;;  %v487_v14 = vld [vmem:[#allocation11 + $0xd0] sm:$0xff] }
  0x8e   :  { %2886 = vmatpush1.bf16.msra.mxu0 %v4046_v33  ;;  %v4120_v11 = vpack.c.bf16 %v492_v10, %v488_v9  ;;  %v491_v15 = vld [vmem:[#allocation11 + $0xf0] sm:$0xff]  ;;  %v496_v16 = vld [vmem:[#allocation11 + $0x118] sm:$0xff] }
  0x8f   :  { %2888 = vmatprep.subr.bf16.mxu0 %v4049_v38  ;;  %2721 = vmatmul.mubr.msk.f32.gmra.mrb[6].mxu1 %vm168_vm0, %v4054_v43  ;;  %v500_v19 = vld [vmem:[#allocation11 + $0x138] sm:$0xff]  ;;  %v495_v21 = vld [vmem:[#allocation11 + $0x110] sm:$0xff] }
  0x90   :  { %281 = vmatprep.mubr.f32.mxu1 %v4683_v0  ;;  %2858 = vmatpush1.bf16.msra.mxu1 %v2857_v45  ;;  %v4131_v20 = vpack.c.bf16 %v500_v19, %v496_v16  ;;  %v499_v22 = vld [vmem:[#allocation11 + $0x130] sm:$0xff]  ;;  %v504_v24 = vld [vmem:[#allocation11 + $0x158] sm:$0xff] }
  0x91   :  { %2892 = vmatprep.subr.bf16.mxu1 %v4059_v47  ;;  %v508_v25 = vld [vmem:[#allocation11 + $0x178] sm:$0xff]  ;;  %v4139_v27 = vpack.c.bf16 %v499_v22, %v495_v21  ;;  %v503_v29 = vld [vmem:[#allocation11 + $0x150] sm:$0xff] }
  0x92   :  { %2890 = vmatpush1.bf16.msra.mxu0 %v4057_v46  ;;  %v4142_v28 = vpack.c.bf16 %v508_v25, %v504_v24  ;;  %v512_v32 = vld [vmem:[#allocation11 + $0x198] sm:$0xff]  ;;  %v511_v37 = vld [vmem:[#allocation11 + $0x190] sm:$0xff] }
  0x93   :  { %2924 = vmatprep.subr.bf16.mxu0 %v3996_v8  ;;  %2722 = vmatmul.mubr.msk.f32.gmra.mrb[8].mxu1 %vm168_vm0, %v4065_v48  ;;  %v516_v34 = vld [vmem:[#allocation11 + $0x1b8] sm:$0xff]  ;;  %v515_v40 = vld [vmem:[#allocation11 + $0x1b0] sm:$0xff] }
  0x94   :  { %287 = vmatprep.mubr.f32.mxu1 %v4683_v0  ;;  %v4153_v36 = vpack.c.bf16 %v516_v34, %v512_v32  ;;  %v520_v41 = vld [vmem:[#allocation11 + $0x1d8] sm:$0xff]  ;;  %v519_v45 = vld [vmem:[#allocation11 + $0x1d0] sm:$0xff] }
  0x95   :  { %590 = vmatmul.mubr.f32.vlgmr.msra.gmra.mrb[0].mxu0 %v4683_v0  ;;  %v524_v42 = vld [vmem:[#allocation11 + $0x1f8] sm:$0xff] }
  0x96   :  { %2926 = vmatpush1.bf16.msra.mxu0 %v3998_v13  ;;  %835 = vmatprep.mubr.f32.mxu0 %v4683_v0 }
  0x97   :  { %2928 = vmatprep.subr.bf16.mxu0 %v4001_v18  ;;  %2723 = vmatmul.mubr.msk.f32.gmra.mrb[10].mxu1 %vm168_vm0, %v4074_v49 }
  0x98   :  { %293 = vmatprep.mubr.f32.mxu1 %v4683_v0 }
  0x9a   :  { %2930 = vmatpush1.bf16.msra.mxu0 %v4005_v26 }
  0x9b   :  { %2932 = vmatprep.subr.bf16.mxu0 %v4007_v31  ;;  %2724 = vmatmul.mubr.msk.f32.gmra.mrb[12].mxu1 %vm168_vm0, %v4082_v50 }
  0x9c   :  { %299 = vmatprep.mubr.f32.mxu1 %v4683_v0 }
  0x9e   :  { %2934 = vmatpush1.bf16.msra.mxu0 %v4010_v39 }
  0x9f   :  { %2936 = vmatprep.subr.bf16.mxu0 %v4013_v44  ;;  %2725 = vmatmul.mubr.msk.f32.gmra.mrb[14].mxu1 %vm168_vm0, %v4089_v51 }
  0xa0   :  { %370 = vmatprep.mubr.f32.mxu1 %v4683_v0 }
  0xa2   :  { %2938 = vmatpush1.bf16.msra.mxu0 %v4016_v52 }
  0xa3   :  { %2940 = vmatprep.subr.bf16.mxu0 %v4019_v56  ;;  %2726 = vmatmul.mubr.msk.f32.vlgmr.msra.gmra.mrb[16].mxu1 %vm168_vm0, %v4021_v62  ;;  %v4117_v62 = vpack.c.bf16 %v483_v7, %v479_v5 }
  0xa4   :  { %2894 = vmatpush1.bf16.msra.mxu1 %v4096_v58  ;;  %376 = vmatprep.mubr.f32.mxu1 %v4683_v0 }
  0xa5   :  { %2896 = vmatprep.subr.bf16.mxu1 %v4098_v59 }
  0xa6   :  { %2942 = vmatpush1.bf16.msra.mxu0 %v4024_v2 }
  0xa7   :  { %2944 = vmatprep.subr.bf16.mxu0 %v4027_v6  ;;  %2727 = vmatmul.mubr.msk.f32.gmra.mrb[18].mxu1 %vm168_vm0, %v4032_v12  ;;  %v4128_v12 = vpack.c.bf16 %v491_v15, %v487_v14 }
  0xa8   :  { %2898 = vmatpush1.bf16.msra.mxu1 %v4106_v3  ;;  %382 = vmatprep.mubr.f32.mxu1 %v4683_v0 }
  0xa9   :  { %2900 = vmatprep.subr.bf16.mxu1 %v4109_v4 }
  0xaa   :  { %2946 = vmatpush1.bf16.msra.mxu0 %v4035_v17 }
  0xab   :  { %2948 = vmatprep.subr.bf16.mxu0 %v4038_v23  ;;  %2728 = vmatmul.mubr.msk.f32.gmra.mrb[20].mxu1 %vm168_vm0, %v4043_v30  ;;  %v507_v30 = vld [vmem:[#allocation11 + $0x170] sm:$0xff] }
  0xac   :  { %2902 = vmatpush1.bf16.msra.mxu1 %v4117_v62  ;;  %388 = vmatprep.mubr.f32.mxu1 %v4683_v0  ;;  %v4150_v35 = vpack.c.bf16 %v507_v30, %v503_v29 }
  0xad   :  { %2904 = vmatprep.subr.bf16.mxu1 %v4120_v11 }
  0xae   :  { %2950 = vmatpush1.bf16.msra.mxu0 %v4046_v33 }
  0xaf   :  { %2952 = vmatprep.subr.bf16.mxu0 %v4049_v38  ;;  %2729 = vmatmul.mubr.msk.f32.gmra.mrb[22].mxu1 %vm168_vm0, %v4054_v43  ;;  %v4162_v43 = vpack.c.bf16 %v524_v42, %v520_v41 }
  0xb0   :  { %2906 = vmatpush1.bf16.msra.mxu1 %v4128_v12  ;;  %394 = vmatprep.mubr.f32.mxu1 %v4683_v0 }
  0xb1   :  { %2908 = vmatprep.subr.bf16.mxu1 %v4131_v20 }
  0xb2   :  { %2954 = vmatpush1.bf16.msra.mxu0 %v4057_v46 }
  0xb3   :  { %2988 = vmatprep.subr.bf16.mxu0 %v3996_v8  ;;  %2730 = vmatmul.mubr.msk.f32.gmra.mrb[24].mxu1 %vm168_vm0, %v4065_v48  ;;  %v4159_v8 = vpack.c.bf16 %v515_v40, %v511_v37  ;;  %v523_v48 = vld [vmem:[#allocation11 + $0x1f0] sm:$0xff] }
  0xb4   :  { %2910 = vmatpush1.bf16.msra.mxu1 %v4139_v27  ;;  %400 = vmatprep.mubr.f32.mxu1 %v4683_v0 }
  0xb5   :  { %2912 = vmatprep.subr.bf16.mxu1 %v4142_v28 }
  0xb7   :  { %2731 = vmatmul.mubr.msk.f32.gmra.mrb[26].mxu1 %vm168_vm0, %v4074_v49  ;;  %v4168_v49 = vpack.c.bf16 %v523_v48, %v519_v45 }
  0xb8   :  { %2914 = vmatpush1.bf16.msra.mxu1 %v4150_v35  ;;  %406 = vmatprep.mubr.f32.mxu1 %v4683_v0 }
  0xb9   :  { %2916 = vmatprep.subr.bf16.mxu1 %v4153_v36 }
  0xbb   :  { %2732 = vmatmul.mubr.msk.f32.gmra.mrb[28].mxu1 %vm168_vm0, %v4082_v50  ;;  %v148_v50 = vlaneseq }
  0xbc   :  { %2918 = vmatpush1.bf16.msra.mxu1 %v4159_v8  ;;  %412 = vmatprep.mubr.f32.mxu1 %v4683_v0 }
  0xbd   :  { %2920 = vmatprep.subr.bf16.mxu1 %v4162_v43 }
  0xbf   :  { %2733 = vmatmul.mubr.msk.f32.gmra.mrb[30].mxu1 %vm168_vm0, %v4089_v51  ;;  %v149_v51 = vshrl.u32 %v148_v50, 7 }
  0xc0   :  { %2922 = vmatpush1.bf16.msra.mxu1 %v4168_v49  ;;  %660 = vmatprep.mubr.f32.mxu1 %v4683_v0 }
  0xc1   :  { %2956 = vmatprep.subr.bf16.mxu1 %v4059_v47  ;;  %v150_v53 = vsub.s32 0, %v149_v51  ;;  %v154_v57 = vsub.s32 1, %v149_v51 }
  0xc3   :  { %661 = vmatmul.mubr.f32.vlgmr.msra.gmra.mrb[16].mxu1 %v4683_v0  ;;  %v151_v61 = vrot.slane %v146_v54, %v150_v53  ;;  %v155_v63 = vrot.slane %v146_v54, %v154_v57 }
  0xc4   :  { %2958 = vmatpush1.bf16.msra.mxu1 %v4096_v58  ;;  %906 = vmatprep.mubr.f32.mxu1 %v4683_v0 }
  0xc5   :  { %2960 = vmatprep.subr.bf16.mxu1 %v4098_v59 }
  0xc8   :  { %2962 = vmatpush1.bf16.msra.mxu1 %v4106_v3 }
  0xc9   :  { %2964 = vmatprep.subr.bf16.mxu1 %v4109_v4 }
  0xcc   :  { %2966 = vmatpush1.bf16.msra.mxu1 %v4117_v62 }
  0xcd   :  { %2968 = vmatprep.subr.bf16.mxu1 %v4120_v11 }
  0xd0   :  { %2970 = vmatpush1.bf16.msra.mxu1 %v4128_v12 }
  0xd1   :  { %2972 = vmatprep.subr.bf16.mxu1 %v4131_v20 }
  0xd4   :  { %2974 = vmatpush1.bf16.msra.mxu1 %v4139_v27 }
  0xd5   :  { %2976 = vmatprep.subr.bf16.mxu1 %v4142_v28 }
  0xd8   :  { %2978 = vmatpush1.bf16.msra.mxu1 %v4150_v35 }
  0xd9   :  { %2980 = vmatprep.subr.bf16.mxu1 %v4153_v36 }
  0xdc   :  { %2982 = vmatpush1.bf16.msra.mxu1 %v4159_v8 }
  0xdd   :  { %2984 = vmatprep.subr.bf16.mxu1 %v4162_v43 }
  0xe0   :  { %2986 = vmatpush1.bf16.msra.mxu1 %v4168_v49 }
  0xe1   :  { %3020 = vmatprep.subr.bf16.mxu1 %v4059_v47 }
 0x156   :  { %v259_v55 = vpop.f32.mrb[0].mxu1 }
 0x157   :  { %v261_v60 = vpop.f32.mrb[1].mxu1  ;;  %v260_v25 = vadd.f32 %v259_v55, %v151_v61 }
 0x158   :  { %v262_v30 = vadd.f32 %v261_v60, %v155_v63 }
 0x15a   :  { %v265_v1 = vpop.f32.mrb[2].mxu1 }
 0x15b   :  { %v4194_v5 = vadd.f32 %v265_v1, %v151_v61  ;;  %v267_v7 = vpop.f32.mrb[3].mxu1 }
 0x15c   :  { %v4196_v9 = vadd.f32 %v267_v7, %v155_v63 }
 0x15e   :  { %v271_v10 = vpop.f32.mrb[4].mxu1 }
 0x15f   :  { %v4198_v14 = vadd.f32 %v271_v10, %v151_v61  ;;  %v273_v15 = vpop.f32.mrb[5].mxu1 }
 0x160   :  { %v4200_v16 = vadd.f32 %v273_v15, %v155_v63 }
 0x162   :  { %v277_v19 = vpop.f32.mrb[6].mxu1 }
 0x163   :  { %v4202_v21 = vadd.f32 %v277_v19, %v151_v61  ;;  %v279_v22 = vpop.f32.mrb[7].mxu1 }
 0x164   :  { %v4204_v24 = vadd.f32 %v279_v22, %v155_v63 }
 0x166   :  { %v283_v29 = vpop.f32.mrb[8].mxu1 }
 0x167   :  { %v4206_v32 = vadd.f32 %v283_v29, %v151_v61  ;;  %v285_v37 = vpop.f32.mrb[9].mxu1 }
 0x168   :  { %v591_v34 = vpop.f32.mrb[0].mxu0  ;;  %v4208_v41 = vadd.f32 %v285_v37, %v155_v63  ;;  %v162_v37 = vsub.s32 3, %v149_v51 }
 0x169   :  { %v667_v40 = vadd.f32 %v591_v34, %v260_v25  ;;  %v593_v42 = vpop.f32.mrb[1].mxu0 }
 0x16a   :  { %v668_v45 = vadd.f32 %v593_v42, %v262_v30  ;;  %v289_v48 = vpop.f32.mrb[10].mxu1  ;;  %v158_v30 = vsub.s32 2, %v149_v51 }
 0x16b   :  { %v4210_v50 = vadd.f32 %v289_v48, %v151_v61  ;;  %v291_v53 = vpop.f32.mrb[11].mxu1  ;;  %v2734_v29 = vmul.f32 -1.442695, %v667_v40 }
 0x16c   :  { %v4212_v57 = vadd.f32 %v291_v53, %v155_v63  ;;  %v2735_v25 = vmul.f32 -1.442695, %v668_v45  ;;  %v4222_v53 = vrot.slane %v146_v54, %v158_v30 }
 0x16e   :  { %v295_v1 = vpop.f32.mrb[12].mxu1  ;;  %3481 = vpow2.f32 %v2735_v25 }
 0x16f   :  { %v4214_v7 = vadd.f32 %v295_v1, %v151_v61  ;;  %v297_v55 = vpop.f32.mrb[13].mxu1  ;;  %3483 = vpow2.f32 %v2734_v29 }
 0x170   :  { %v4216_v60 = vadd.f32 %v297_v55, %v155_v63  ;;  %v4224_v55 = vrot.slane %v146_v54, %v162_v37 }
 0x172   :  { %v301_v10 = vpop.f32.mrb[14].mxu1 }
 0x173   :  { %v4218_v15 = vadd.f32 %v301_v10, %v151_v61  ;;  %v303_v19 = vpop.f32.mrb[15].mxu1 }
 0x174   :  { %v4220_v22 = vadd.f32 %v303_v19, %v155_v63 }
 0x178   :  { %v3482_v34 = vpop.eup %3481 }
 0x179   :  { %v3484_v42 = vpop.eup %3483  ;;  %v680_v48 = vadd.f32 1.0, %v3482_v34 }
 0x17a   :  { %v674_v1 = vadd.f32 1.0, %v3484_v42 }
 0x17b   :  { %3485 = vrcp.f32 %v680_v48  ;;  %v4685_v48 = vmov 0.0  }
 0x17c   :  { %3487 = vrcp.f32 %v674_v1 }
 0x185   :  { %v3486_v10 = vpop.eup %3485 }
 0x186   :  { %v3488_v51 = vpop.eup %3487  ;;  %v691_v25 = vmul.f32 0.0, %v3486_v10 }
 0x196   :  { %v662_v0 = vpop.f32.mrb[16].mxu1 }
 0x197   :  { %v3435_v61 = vadd.f32 %v662_v0, %v4222_v53  ;;  %v664_v63 = vpop.f32.mrb[17].mxu1 }
 0x198   :  { %v3436_v40 = vadd.f32 %v664_v63, %v4224_v55 }
 0x199   :  { %3489 = vtanh.f32 %v3435_v61 }
 0x19a   :  { %v2736_v45 = vmul.f32 -1.442695, %v3436_v40 }
 0x19c   :  { %3491 = vpow2.f32 %v2736_v45 }
 0x1a3   :  { %v3490_v19 = vpop.eup %3489 }
 0x1a4   :  { %v692_v29 = vmul.f32 %v3490_v19, %v3488_v51 }
 0x1a6   :  { %v3492_v30 = vpop.eup %3491  ;;  %v4228_v34 = vadd.f32 %v692_v29, %v691_v25  ;;  %v1217_v25 = vld [vmem:[#allocation11 + $0x80] sm:$0xff] }
 0x1a7   :  { %v687_v54 = vadd.f32 1.0, %v3492_v30  ;;  %v1221_v29 = vld [vmem:[#allocation11 + $0xa0] sm:$0xff] }
 0x1a8   :  { %3493 = vtanh.f32 %v4228_v34  ;;  %v4310_v30 = vpack.c.bf16 %v1221_v29, %v1217_v25 }
 0x1a9   :  { %3495 = vrcp.f32 %v687_v54  ;;  %v1230_v54 = vld [vmem:[#allocation11 + $0xe8] sm:$0xff] }
 0x1b2   :  { %v3494_v0 = vpop.eup %3493 }
 0x1b3   :  { %v3496_v37 = vpop.eup %3495 }
 0x1b4   :  { %v4231_v42 = vmul.f32 %v3496_v37, %v3494_v0  ;;  %v1225_v37 = vld [vmem:[#allocation11 + $0xc0] sm:$0xff] }
 0x1b6   :  { %836 = vmatmul.mubr.f32.vlgmr.msra.gmra.mrb[2].mxu0 %v4231_v42  ;;  %907 = vmatmul.mubr.f32.vlgmr.msra.gmra.mrb[18].mxu1 %v4231_v42 }
 0x1b7   :  { %2990 = vmatpush1.bf16.msra.mxu0 %v3998_v13  ;;  %3022 = vmatpush1.bf16.msra.mxu1 %v4096_v58 }
 0x1b8   :  { %2992 = vmatprep.subr.bf16.mxu0 %v4001_v18  ;;  %3024 = vmatprep.subr.bf16.mxu1 %v4098_v59 }
 0x1b9   :  { %1082 = vmatprep.mubr.f32.mxu0 %v4685_v48  ;;  %1153 = vmatprep.mubr.f32.mxu1 %v4685_v48 }
 0x1bb   :  { %2994 = vmatpush1.bf16.msra.mxu0 %v4005_v26  ;;  %3026 = vmatpush1.bf16.msra.mxu1 %v4106_v3 }
 0x1bc   :  { %2996 = vmatprep.subr.bf16.mxu0 %v4007_v31  ;;  %3028 = vmatprep.subr.bf16.mxu1 %v4109_v4 }
 0x1bf   :  { %2998 = vmatpush1.bf16.msra.mxu0 %v4010_v39  ;;  %3030 = vmatpush1.bf16.msra.mxu1 %v4117_v62 }
 0x1c0   :  { %3000 = vmatprep.subr.bf16.mxu0 %v4013_v44  ;;  %3032 = vmatprep.subr.bf16.mxu1 %v4120_v11 }
 0x1c3   :  { %3002 = vmatpush1.bf16.msra.mxu0 %v4016_v52  ;;  %3034 = vmatpush1.bf16.msra.mxu1 %v4128_v12 }
 0x1c4   :  { %3004 = vmatprep.subr.bf16.mxu0 %v4019_v56  ;;  %3036 = vmatprep.subr.bf16.mxu1 %v4131_v20 }
 0x1c7   :  { %3006 = vmatpush1.bf16.msra.mxu0 %v4024_v2  ;;  %3038 = vmatpush1.bf16.msra.mxu1 %v4139_v27 }
 0x1c8   :  { %3008 = vmatprep.subr.bf16.mxu0 %v4027_v6  ;;  %3040 = vmatprep.subr.bf16.mxu1 %v4142_v28 }
 0x1cb   :  { %3010 = vmatpush1.bf16.msra.mxu0 %v4035_v17  ;;  %3042 = vmatpush1.bf16.msra.mxu1 %v4150_v35 }
 0x1cc   :  { %3012 = vmatprep.subr.bf16.mxu0 %v4038_v23  ;;  %3044 = vmatprep.subr.bf16.mxu1 %v4153_v36 }
 0x1cf   :  { %3014 = vmatpush1.bf16.msra.mxu0 %v4046_v33  ;;  %3046 = vmatpush1.bf16.msra.mxu1 %v4159_v8 }
 0x1d0   :  { %3016 = vmatprep.subr.bf16.mxu0 %v4049_v38  ;;  %3048 = vmatprep.subr.bf16.mxu1 %v4162_v43 }
 0x1d3   :  { %3018 = vmatpush1.bf16.msra.mxu0 %v4057_v46  ;;  %3050 = vmatpush1.bf16.msra.mxu1 %v4168_v49 }
 0x1d4   :  { %3084 = vmatprep.subr.bf16.mxu1 %v4059_v47 }
 0x289   :  { %v837_v13 = vpop.f32.mrb[2].mxu0  ;;  %v908_v18 = vpop.f32.mrb[18].mxu1 }
 0x28a   :  { %v913_v26 = vadd.f32 %v837_v13, %v4194_v5  ;;  %v839_v31 = vpop.f32.mrb[3].mxu0  ;;  %v910_v39 = vpop.f32.mrb[19].mxu1  ;;  %v3437_v17 = vadd.f32 %v908_v18, %v4222_v53  ;;  %v1229_v13 = vld [vmem:[#allocation11 + $0xe0] sm:$0xff] }
 0x28b   :  { %v914_v44 = vadd.f32 %v839_v31, %v4196_v9  ;;  %v3438_v2 = vadd.f32 %v910_v39, %v4224_v55  ;;  %v4316_v18 = vpack.c.bf16 %v1229_v13, %v1225_v37  ;;  %v1238_v31 = vld [vmem:[#allocation11 + $0x128] sm:$0xff] }
 0x28c   :  { %v2737_v52 = vmul.f32 -1.442695, %v913_v26  ;;  %v1234_v26 = vld [vmem:[#allocation11 + $0x108] sm:$0xff] }
 0x28d   :  { %v2738_v56 = vmul.f32 -1.442695, %v914_v44  ;;  %v2739_v6 = vmul.f32 -1.442695, %v3438_v2  ;;  %v4320_v39 = vpack.c.bf16 %v1238_v31, %v1234_v26  ;;  %v1233_v44 = vld [vmem:[#allocation11 + $0x100] sm:$0xff]  ;;  %v1242_v2 = vld [vmem:[#allocation11 + $0x148] sm:$0xff] }
 0x28e   :  { %3497 = vpow2.f32 %v2737_v52  ;;  %v1237_v52 = vld [vmem:[#allocation11 + $0x120] sm:$0xff] }
 0x28f   :  { %3499 = vpow2.f32 %v2738_v56  ;;  %v4322_v56 = vpack.c.bf16 %v1237_v52, %v1233_v44 }
 0x290   :  { %3501 = vpow2.f32 %v2739_v6  ;;  %v1246_v6 = vld [vmem:[#allocation11 + $0x168] sm:$0xff] }
 0x291   :  { %3503 = vtanh.f32 %v3437_v17  ;;  %v1241_v17 = vld [vmem:[#allocation11 + $0x140] sm:$0xff] }
 0x298   :  { %v3498_v23 = vpop.eup %3497 }
 0x299   :  { %v3500_v33 = vpop.eup %3499  ;;  %v920_v38 = vadd.f32 1.0, %v3498_v23  ;;  %v4326_v23 = vpack.c.bf16 %v1246_v6, %v1242_v2 }
 0x29a   :  { %v926_v46 = vadd.f32 1.0, %v3500_v33  ;;  %v3502_v47 = vpop.eup %3501  ;;  %v1245_v33 = vld [vmem:[#allocation11 + $0x160] sm:$0xff] }
 0x29b   :  { %3505 = vrcp.f32 %v920_v38  ;;  %v3504_v49 = vpop.eup %3503  ;;  %v933_v61 = vadd.f32 1.0, %v3502_v47  ;;  %v1250_v38 = vld [vmem:[#allocation11 + $0x188] sm:$0xff]  ;;  %v4328_v47 = vpack.c.bf16 %v1245_v33, %v1241_v17 }
 0x29c   :  { %3507 = vrcp.f32 %v926_v46  ;;  %v1254_v46 = vld [vmem:[#allocation11 + $0x1a8] sm:$0xff] }
 0x29d   :  { %3509 = vrcp.f32 %v933_v61  ;;  %v1262_v61 = vld [vmem:[#allocation11 + $0x1e8] sm:$0xff] }
 0x2a5   :  { %v3506_v5 = vpop.eup %3505 }
 0x2a6   :  { %v3508_v9 = vpop.eup %3507  ;;  %v938_v1 = vmul.f32 %v3506_v5, %v3504_v49  ;;  %v4330_v49 = vpack.c.bf16 %v1254_v46, %v1250_v38  ;;  %v1249_v5 = vld [vmem:[#allocation11 + $0x180] sm:$0xff] }
 0x2a7   :  { %v937_v63 = vmul.f32 %v3508_v9, %v4228_v34  ;;  %v3510_v45 = vpop.eup %3509  ;;  %v1226_v34 = vld [vmem:[#allocation11 + $0xc8] sm:$0xff]  ;;  %v1253_v9 = vld [vmem:[#allocation11 + $0x1a0] sm:$0xff] }
 0x2a8   :  { %v4314_v0 = vpack.c.bf16 %v1230_v54, %v1226_v34 }
 0x2a9   :  { %v4273_v40 = vadd.f32 %v938_v1, %v937_v63  ;;  %v1258_v1 = vld [vmem:[#allocation11 + $0x1c8] sm:$0xff]  ;;  %v1259_v63 = vld [vmem:[#allocation11 + $0x1d0] sm:$0xff] }
 0x2ab   :  { %3511 = vtanh.f32 %v4273_v40 }
 0x2b5   :  { %v3512_v10 = vpop.eup %3511 }
 0x2b6   :  { %v4276_v51 = vmul.f32 %v3512_v10, %v3510_v45  ;;  %v1263_v45 = vld [vmem:[#allocation11 + $0x1f0] sm:$0xff]  ;;  %v4334_v10 = vpack.c.bf16 %v1253_v9, %v1249_v5 }
 0x2b8   :  { %1083 = vmatmul.mubr.f32.vlgmr.msra.gmra.mrb[4].mxu0 %v4276_v51  ;;  %1154 = vmatmul.mubr.f32.vlgmr.msra.gmra.mrb[20].mxu1 %v4276_v51 }
 0x2b9   :  { %3086 = vmatpush1.bf16.msra.mxu1 %v4096_v58  ;;  %1329 = vmatprep.mubr.f32.mxu0 %v4685_v48  ;;  %v1202_v58 = vld [vmem:[#allocation11 + $0x8] sm:$0xff] }
 0x2ba   :  { %3088 = vmatprep.subr.bf16.mxu1 %v4098_v59  ;;  %1400 = vmatprep.mubr.f32.mxu1 %v4685_v48  ;;  %v1206_v59 = vld [vmem:[#allocation11 + $0x28] sm:$0xff] }
 0x2bd   :  { %3090 = vmatpush1.bf16.msra.mxu1 %v4106_v3  ;;  %v4296_v3 = vpack.c.bf16 %v1206_v59, %v1202_v58  ;;  %v4336_v58 = vpack.c.bf16 %v1263_v45, %v1259_v63  ;;  %v4339_v59 = vpack.c.bf16 %v1262_v61, %v1258_v1  ;;  %v1455_v61 = vld [vmem:[#allocation11 + $0x38] sm:$0xff]  ;;  %v1450_v45 = vld [vmem:[#allocation11 + $0x10] sm:$0xff] }
 0x2be   :  { %3092 = vmatprep.subr.bf16.mxu1 %v4109_v4  ;;  %v1201_v4 = vld [vmem:[#allocation11] sm:$0xff] }
 0x2bf   :  { %3052 = vmatprep.subr.bf16.mxu0 %v4296_v3 }
 0x2c1   :  { %3094 = vmatpush1.bf16.msra.mxu1 %v4117_v62  ;;  %v1205_v62 = vld [vmem:[#allocation11 + $0x20] sm:$0xff] }
 0x2c2   :  { %3096 = vmatprep.subr.bf16.mxu1 %v4120_v11  ;;  %v4298_v11 = vpack.c.bf16 %v1205_v62, %v1201_v4  ;;  %v1257_v4 = vld [vmem:[#allocation11 + $0x1c0] sm:$0xff] }
 0x2c3   :  { %v1261_v62 = vld [vmem:[#allocation11 + $0x1e0] sm:$0xff] }
 0x2c4   :  { %3054 = vmatpush1.bf16.msra.mxu0 %v4298_v11 }
 0x2c5   :  { %3098 = vmatpush1.bf16.msra.mxu1 %v4128_v12  ;;  %v1210_v12 = vld [vmem:[#allocation11 + $0x48] sm:$0xff] }
 0x2c6   :  { %3100 = vmatprep.subr.bf16.mxu1 %v4131_v20  ;;  %v1214_v20 = vld [vmem:[#allocation11 + $0x68] sm:$0xff] }
 0x2c9   :  { %3102 = vmatpush1.bf16.msra.mxu1 %v4139_v27  ;;  %v4302_v27 = vpack.c.bf16 %v1214_v20, %v1210_v12  ;;  %v4343_v12 = vpack.c.bf16 %v1261_v62, %v1257_v4  ;;  %v1454_v4 = vld [vmem:[#allocation11 + $0x30] sm:$0xff] }
 0x2ca   :  { %3104 = vmatprep.subr.bf16.mxu1 %v4142_v28  ;;  %v1209_v28 = vld [vmem:[#allocation11 + $0x40] sm:$0xff]  ;;  %v4380_v62 = vpack.c.bf16 %v1454_v4, %v1450_v45  ;;  %v1490_v45 = vld [vmem:[#allocation11 + $0x150] sm:$0xff] }
 0x2cb   :  { %3056 = vmatprep.subr.bf16.mxu0 %v4302_v27 }
 0x2cd   :  { %3106 = vmatpush1.bf16.msra.mxu1 %v4150_v35  ;;  %v1213_v35 = vld [vmem:[#allocation11 + $0x60] sm:$0xff] }
 0x2ce   :  { %3108 = vmatprep.subr.bf16.mxu1 %v4153_v36  ;;  %v4304_v36 = vpack.c.bf16 %v1213_v35, %v1209_v28 }
 0x2d0   :  { %3058 = vmatpush1.bf16.msra.mxu0 %v4304_v36 }
 0x2d1   :  { %3110 = vmatpush1.bf16.msra.mxu1 %v4159_v8  ;;  %v1218_v8 = vld [vmem:[#allocation11 + $0x88] sm:$0xff] }
 0x2d2   :  { %3112 = vmatprep.subr.bf16.mxu1 %v4162_v43  ;;  %v1222_v43 = vld [vmem:[#allocation11 + $0xa8] sm:$0xff] }
 0x2d3   :  { %v4308_v19 = vpack.c.bf16 %v1222_v43, %v1218_v8 }
 0x2d5   :  { %3060 = vmatprep.subr.bf16.mxu0 %v4308_v19  ;;  %3114 = vmatpush1.bf16.msra.mxu1 %v4336_v58 }
 0x2d6   :  { %3062 = vmatpush1.bf16.msra.mxu0 %v4310_v30 }
 0x2d7   :  { %3064 = vmatprep.subr.bf16.mxu0 %v4314_v0 }
 0x2da   :  { %3066 = vmatpush1.bf16.msra.mxu0 %v4316_v18 }
 0x2db   :  { %3068 = vmatprep.subr.bf16.mxu0 %v4320_v39 }
 0x2de   :  { %3070 = vmatpush1.bf16.msra.mxu0 %v4322_v56 }
 0x2df   :  { %3072 = vmatprep.subr.bf16.mxu0 %v4326_v23 }
 0x2e2   :  { %3074 = vmatpush1.bf16.msra.mxu0 %v4328_v47 }
 0x2e3   :  { %3076 = vmatprep.subr.bf16.mxu0 %v4330_v49 }
 0x2e6   :  { %3078 = vmatpush1.bf16.msra.mxu0 %v4334_v10 }
 0x2e7   :  { %3080 = vmatprep.subr.bf16.mxu0 %v4339_v59 }
 0x2ea   :  { %3082 = vmatpush1.bf16.msra.mxu0 %v4343_v12 }
 0x2eb   :  { %3116 = vmatprep.subr.bf16.mxu0 %v4296_v3 }
 0x38b   :  { %v1084_v20 = vpop.f32.mrb[4].mxu0  ;;  %v1155_v28 = vpop.f32.mrb[20].mxu1 }
 0x38c   :  { %v1160_v35 = vadd.f32 %v1084_v20, %v4198_v14  ;;  %v1086_v8 = vpop.f32.mrb[5].mxu0  ;;  %v1157_v43 = vpop.f32.mrb[21].mxu1  ;;  %v3439_v13 = vadd.f32 %v1155_v28, %v4222_v53  ;;  %v1459_v20 = vld [vmem:[#allocation11 + $0x58] sm:$0xff] }
 0x38d   :  { %v1161_v25 = vadd.f32 %v1086_v8, %v4200_v16  ;;  %v3440_v54 = vadd.f32 %v1157_v43, %v4224_v55  ;;  %v1463_v28 = vld [vmem:[#allocation11 + $0x78] sm:$0xff]  ;;  %v1458_v8 = vld [vmem:[#allocation11 + $0x50] sm:$0xff] }
 0x38e   :  { %v2740_v29 = vmul.f32 -1.442695, %v1160_v35  ;;  %v4384_v35 = vpack.c.bf16 %v1463_v28, %v1459_v20  ;;  %v1462_v43 = vld [vmem:[#allocation11 + $0x70] sm:$0xff]  ;;  %v1499_v28 = vld [vmem:[#allocation11 + $0x198] sm:$0xff] }
 0x38f   :  { %v2741_v34 = vmul.f32 -1.442695, %v1161_v25  ;;  %v2742_v37 = vmul.f32 -1.442695, %v3440_v54  ;;  %v4386_v25 = vpack.c.bf16 %v1462_v43, %v1458_v8  ;;  %v1494_v20 = vld [vmem:[#allocation11 + $0x170] sm:$0xff]  ;;  %v1503_v8 = vld [vmem:[#allocation11 + $0x1b8] sm:$0xff] }
 0x390   :  { %3513 = vpow2.f32 %v2740_v29  ;;  %v1467_v29 = vld [vmem:[#allocation11 + $0x98] sm:$0xff]  ;;  %v4410_v43 = vpack.c.bf16 %v1494_v20, %v1490_v45 }
 0x391   :  { %3515 = vpow2.f32 %v2741_v34  ;;  %v1471_v34 = vld [vmem:[#allocation11 + $0xb8] sm:$0xff] }
 0x392   :  { %3517 = vpow2.f32 %v2742_v37  ;;  %v4390_v54 = vpack.c.bf16 %v1471_v34, %v1467_v29  ;;  %v1466_v37 = vld [vmem:[#allocation11 + $0x90] sm:$0xff]  ;;  %v4412_v29 = vpack.c.bf16 %v1503_v8, %v1499_v28 }
 0x393   :  { %3519 = vtanh.f32 %v3439_v13  ;;  %v1470_v13 = vld [vmem:[#allocation11 + $0xb0] sm:$0xff] }
 0x394   :  { %v1498_v34 = vld [vmem:[#allocation11 + $0x190] sm:$0xff] }
 0x39a   :  { %v3514_v26 = vpop.eup %3513 }
 0x39b   :  { %v3516_v31 = vpop.eup %3515  ;;  %v1167_v44 = vadd.f32 1.0, %v3514_v26  ;;  %v4392_v26 = vpack.c.bf16 %v1470_v13, %v1466_v37  ;;  %v1502_v37 = vld [vmem:[#allocation11 + $0x1b0] sm:$0xff]  ;;  %v1507_v13 = vld [vmem:[#allocation11 + $0x1d8] sm:$0xff] }
 0x39c   :  { %v1173_v52 = vadd.f32 1.0, %v3516_v31  ;;  %v3518_v14 = vpop.eup %3517  ;;  %v1475_v31 = vld [vmem:[#allocation11 + $0xd8] sm:$0xff] }
 0x39d   :  { %3521 = vrcp.f32 %v1167_v44  ;;  %v3520_v2 = vpop.eup %3519  ;;  %v1180_v33 = vadd.f32 1.0, %v3518_v14  ;;  %v1479_v44 = vld [vmem:[#allocation11 + $0xf8] sm:$0xff]  ;;  %v1474_v14 = vld [vmem:[#allocation11 + $0xd0] sm:$0xff] }
 0x39e   :  { %3523 = vrcp.f32 %v1173_v52  ;;  %v4396_v52 = vpack.c.bf16 %v1479_v44, %v1475_v31  ;;  %v1511_v31 = vld [vmem:[#allocation11 + $0x1f8] sm:$0xff]  ;;  %v4416_v44 = vpack.c.bf16 %v1502_v37, %v1498_v34 }
 0x39f   :  { %3525 = vrcp.f32 %v1180_v33 }
 0x3a7   :  { %v3522_v16 = vpop.eup %3521 }
 0x3a8   :  { %v3524_v6 = vpop.eup %3523  ;;  %v1185_v17 = vmul.f32 %v3522_v16, %v3520_v2  ;;  %v1478_v2 = vld [vmem:[#allocation11 + $0xf0] sm:$0xff] }
 0x3a9   :  { %v1184_v38 = vmul.f32 %v3524_v6, %v4273_v40  ;;  %v3526_v5 = vpop.eup %3525  ;;  %v1451_v40 = vld [vmem:[#allocation11 + $0x18] sm:$0xff]  ;;  %v4398_v16 = vpack.c.bf16 %v1478_v2, %v1474_v14  ;;  %v4419_v14 = vpack.c.bf16 %v1511_v31, %v1507_v13 }
 0x3aa   :  { %v4378_v63 = vpack.c.bf16 %v1455_v61, %v1451_v40  ;;  %v1483_v6 = vld [vmem:[#allocation11 + $0x118] sm:$0xff] }
 0x3ab   :  { %v4353_v46 = vadd.f32 %v1185_v17, %v1184_v38  ;;  %v1487_v17 = vld [vmem:[#allocation11 + $0x138] sm:$0xff]  ;;  %v1482_v38 = vld [vmem:[#allocation11 + $0x110] sm:$0xff] }
 0x3ac   :  { %3148 = vmatprep.subr.bf16.mxu1 %v4378_v63  ;;  %v4402_v33 = vpack.c.bf16 %v1487_v17, %v1483_v6  ;;  %v1491_v40 = vld [vmem:[#allocation11 + $0x158] sm:$0xff] }
 0x3ad   :  { %3527 = vtanh.f32 %v4353_v46  ;;  %v1495_v61 = vld [vmem:[#allocation11 + $0x178] sm:$0xff] }
 0x3ae   :  { %v4408_v4 = vpack.c.bf16 %v1495_v61, %v1491_v40 }
 0x3b7   :  { %v3528_v9 = vpop.eup %3527 }
 0x3b8   :  { %v4356_v1 = vmul.f32 %v3528_v9, %v3526_v5  ;;  %v1486_v5 = vld [vmem:[#allocation11 + $0x130] sm:$0xff] }
 0x3b9   :  { %v4404_v9 = vpack.c.bf16 %v1486_v5, %v1482_v38 }
 0x3ba   :  { %1330 = vmatmul.mubr.f32.vlgmr.msra.gmra.mrb[6].mxu0 %v4356_v1  ;;  %1401 = vmatmul.mubr.f32.vlgmr.msra.gmra.mrb[22].mxu1 %v4356_v1 }
 0x3bb   :  { %3118 = vmatpush1.bf16.msra.mxu0 %v4298_v11  ;;  %1576 = vmatprep.mubr.f32.mxu0 %v4685_v48 }
 0x3bc   :  { %3120 = vmatprep.subr.bf16.mxu0 %v4302_v27  ;;  %1647 = vmatprep.mubr.f32.mxu1 %v4685_v48 }
 0x3bd   :  { %3150 = vmatpush1.bf16.msra.mxu1 %v4380_v62 }
 0x3be   :  { %3152 = vmatprep.subr.bf16.mxu1 %v4384_v35 }
 0x3bf   :  { %3122 = vmatpush1.bf16.msra.mxu0 %v4304_v36 }
 0x3c0   :  { %3124 = vmatprep.subr.bf16.mxu0 %v4308_v19 }
 0x3c1   :  { %3154 = vmatpush1.bf16.msra.mxu1 %v4386_v25 }
 0x3c2   :  { %3156 = vmatprep.subr.bf16.mxu1 %v4390_v54 }
 0x3c3   :  { %3126 = vmatpush1.bf16.msra.mxu0 %v4310_v30 }
 0x3c4   :  { %3128 = vmatprep.subr.bf16.mxu0 %v4314_v0 }
 0x3c5   :  { %3158 = vmatpush1.bf16.msra.mxu1 %v4392_v26 }
 0x3c6   :  { %3160 = vmatprep.subr.bf16.mxu1 %v4396_v52 }
 0x3c7   :  { %3130 = vmatpush1.bf16.msra.mxu0 %v4316_v18 }
 0x3c8   :  { %3132 = vmatprep.subr.bf16.mxu0 %v4320_v39 }
 0x3c9   :  { %3162 = vmatpush1.bf16.msra.mxu1 %v4398_v16 }
 0x3ca   :  { %3164 = vmatprep.subr.bf16.mxu1 %v4402_v33 }
 0x3cb   :  { %3134 = vmatpush1.bf16.msra.mxu0 %v4322_v56 }
 0x3cc   :  { %3136 = vmatprep.subr.bf16.mxu0 %v4326_v23 }
 0x3cd   :  { %3166 = vmatpush1.bf16.msra.mxu1 %v4404_v9 }
 0x3ce   :  { %3168 = vmatprep.subr.bf16.mxu1 %v4408_v4 }
 0x3cf   :  { %3138 = vmatpush1.bf16.msra.mxu0 %v4328_v47 }
 0x3d0   :  { %3140 = vmatprep.subr.bf16.mxu0 %v4330_v49 }
 0x3d1   :  { %3170 = vmatpush1.bf16.msra.mxu1 %v4410_v43 }
 0x3d2   :  { %3172 = vmatprep.subr.bf16.mxu1 %v4412_v29 }
 0x3d3   :  { %3142 = vmatpush1.bf16.msra.mxu0 %v4334_v10 }
 0x3d4   :  { %3144 = vmatprep.subr.bf16.mxu0 %v4339_v59 }
 0x3d5   :  { %3174 = vmatpush1.bf16.msra.mxu1 %v4416_v44 }
 0x3d6   :  { %3176 = vmatprep.subr.bf16.mxu1 %v4419_v14 }
 0x3d7   :  { %3146 = vmatpush1.bf16.msra.mxu0 %v4343_v12 }
 0x3d8   :  { %3180 = vmatprep.subr.bf16.mxu0 %v4296_v3 }
 0x3d9   :  { %3178 = vmatpush1.bf16.msra.mxu1 %v4336_v58 }
 0x3da   :  { %3212 = vmatprep.subr.bf16.mxu1 %v4378_v63 }
 0x48d   :  { %v1331_v2 = vpop.f32.mrb[6].mxu0  ;;  %v1402_v6 = vpop.f32.mrb[22].mxu1 }
 0x48e   :  { %v1407_v17 = vadd.f32 %v1331_v2, %v4202_v21  ;;  %v1333_v38 = vpop.f32.mrb[7].mxu0  ;;  %v1404_v5 = vpop.f32.mrb[23].mxu1  ;;  %v3441_v8 = vadd.f32 %v1402_v6, %v4222_v53 }
 0x48f   :  { %v1408_v40 = vadd.f32 %v1333_v38, %v4204_v24  ;;  %v3442_v20 = vadd.f32 %v1404_v5, %v4224_v55 }
 0x490   :  { %v2743_v61 = vmul.f32 -1.442695, %v1407_v17 }
 0x491   :  { %v2744_v45 = vmul.f32 -1.442695, %v1408_v40  ;;  %v2745_v28 = vmul.f32 -1.442695, %v3442_v20 }
 0x492   :  { %3529 = vpow2.f32 %v2743_v61 }
 0x493   :  { %3531 = vpow2.f32 %v2744_v45 }
 0x494   :  { %3533 = vpow2.f32 %v2745_v28 }
 0x495   :  { %3535 = vtanh.f32 %v3441_v8 }
 0x49c   :  { %v3530_v34 = vpop.eup %3529 }
 0x49d   :  { %v3532_v37 = vpop.eup %3531  ;;  %v1414_v13 = vadd.f32 1.0, %v3530_v34 }
 0x49e   :  { %v1420_v31 = vadd.f32 1.0, %v3532_v37  ;;  %v3534_v21 = vpop.eup %3533 }
 0x49f   :  { %3537 = vrcp.f32 %v1414_v13  ;;  %v3536_v2 = vpop.eup %3535  ;;  %v1427_v40 = vadd.f32 1.0, %v3534_v21 }
 0x4a0   :  { %3539 = vrcp.f32 %v1420_v31 }
 0x4a1   :  { %3541 = vrcp.f32 %v1427_v40 }
 0x4a9   :  { %v3538_v24 = vpop.eup %3537 }
 0x4aa   :  { %v3540_v17 = vpop.eup %3539  ;;  %v1432_v38 = vmul.f32 %v3538_v24, %v3536_v2 }
 0x4ab   :  { %v1431_v61 = vmul.f32 %v3540_v17, %v4353_v46  ;;  %v3542_v6 = vpop.eup %3541 }
 0x4ad   :  { %v4430_v5 = vadd.f32 %v1432_v38, %v1431_v61 }
 0x4af   :  { %3543 = vtanh.f32 %v4430_v5 }
 0x4b9   :  { %v3544_v45 = vpop.eup %3543 }
 0x4ba   :  { %v4433_v20 = vmul.f32 %v3544_v45, %v3542_v6 }
 0x4bc   :  { %1577 = vmatmul.mubr.f32.vlgmr.msra.gmra.mrb[8].mxu0 %v4433_v20  ;;  %1648 = vmatmul.mubr.f32.vlgmr.msra.gmra.mrb[24].mxu1 %v4433_v20 }
 0x4bd   :  { %3182 = vmatpush1.bf16.msra.mxu0 %v4298_v11  ;;  %3214 = vmatpush1.bf16.msra.mxu1 %v4380_v62 }
 0x4be   :  { %3184 = vmatprep.subr.bf16.mxu0 %v4302_v27  ;;  %3216 = vmatprep.subr.bf16.mxu1 %v4384_v35 }
 0x4bf   :  { %1823 = vmatprep.mubr.f32.mxu0 %v4685_v48  ;;  %1894 = vmatprep.mubr.f32.mxu1 %v4685_v48 }
 0x4c1   :  { %3186 = vmatpush1.bf16.msra.mxu0 %v4304_v36  ;;  %3218 = vmatpush1.bf16.msra.mxu1 %v4386_v25 }
 0x4c2   :  { %3188 = vmatprep.subr.bf16.mxu0 %v4308_v19  ;;  %3220 = vmatprep.subr.bf16.mxu1 %v4390_v54 }
 0x4c5   :  { %3190 = vmatpush1.bf16.msra.mxu0 %v4310_v30  ;;  %3222 = vmatpush1.bf16.msra.mxu1 %v4392_v26 }
 0x4c6   :  { %3192 = vmatprep.subr.bf16.mxu0 %v4314_v0  ;;  %3224 = vmatprep.subr.bf16.mxu1 %v4396_v52 }
 0x4c9   :  { %3194 = vmatpush1.bf16.msra.mxu0 %v4316_v18  ;;  %3226 = vmatpush1.bf16.msra.mxu1 %v4398_v16 }
 0x4ca   :  { %3196 = vmatprep.subr.bf16.mxu0 %v4320_v39  ;;  %3228 = vmatprep.subr.bf16.mxu1 %v4402_v33 }
 0x4cd   :  { %3198 = vmatpush1.bf16.msra.mxu0 %v4322_v56  ;;  %3230 = vmatpush1.bf16.msra.mxu1 %v4404_v9 }
 0x4ce   :  { %3200 = vmatprep.subr.bf16.mxu0 %v4326_v23  ;;  %3232 = vmatprep.subr.bf16.mxu1 %v4408_v4 }
 0x4d1   :  { %3202 = vmatpush1.bf16.msra.mxu0 %v4328_v47  ;;  %3234 = vmatpush1.bf16.msra.mxu1 %v4410_v43 }
 0x4d2   :  { %3204 = vmatprep.subr.bf16.mxu0 %v4330_v49  ;;  %3236 = vmatprep.subr.bf16.mxu1 %v4412_v29 }
 0x4d5   :  { %3206 = vmatpush1.bf16.msra.mxu0 %v4334_v10  ;;  %3238 = vmatpush1.bf16.msra.mxu1 %v4416_v44 }
 0x4d6   :  { %3208 = vmatprep.subr.bf16.mxu0 %v4339_v59  ;;  %3240 = vmatprep.subr.bf16.mxu1 %v4419_v14 }
 0x4d9   :  { %3210 = vmatpush1.bf16.msra.mxu0 %v4343_v12  ;;  %3242 = vmatpush1.bf16.msra.mxu1 %v4336_v58 }
 0x4da   :  { %3244 = vmatprep.subr.bf16.mxu0 %v4296_v3  ;;  %3276 = vmatprep.subr.bf16.mxu1 %v4378_v63 }
 0x58f   :  { %v1578_v46 = vpop.f32.mrb[8].mxu0  ;;  %v1649_v28 = vpop.f32.mrb[24].mxu1 }
 0x590   :  { %v1654_v8 = vadd.f32 %v1578_v46, %v4206_v32  ;;  %v1580_v34 = vpop.f32.mrb[9].mxu0  ;;  %v1651_v37 = vpop.f32.mrb[25].mxu1  ;;  %v3443_v17 = vadd.f32 %v1649_v28, %v4222_v53 }
 0x591   :  { %v1655_v13 = vadd.f32 %v1580_v34, %v4208_v41  ;;  %v3444_v2 = vadd.f32 %v1651_v37, %v4224_v55 }
 0x592   :  { %v2746_v31 = vmul.f32 -1.442695, %v1654_v8 }
 0x593   :  { %v2747_v21 = vmul.f32 -1.442695, %v1655_v13  ;;  %v2748_v24 = vmul.f32 -1.442695, %v3444_v2 }
 0x594   :  { %3545 = vpow2.f32 %v2746_v31 }
 0x595   :  { %3547 = vpow2.f32 %v2747_v21 }
 0x596   :  { %3549 = vpow2.f32 %v2748_v24 }
 0x597   :  { %3551 = vtanh.f32 %v3443_v17 }
 0x59e   :  { %v3546_v3 = vpop.eup %3545 }
 0x59f   :  { %v3548_v38 = vpop.eup %3547  ;;  %v1661_v40 = vadd.f32 1.0, %v3546_v3 }
 0x5a0   :  { %v1667_v61 = vadd.f32 1.0, %v3548_v38  ;;  %v3550_v32 = vpop.eup %3549 }
 0x5a1   :  { %3553 = vrcp.f32 %v1661_v40  ;;  %v3552_v6 = vpop.eup %3551  ;;  %v1674_v8 = vadd.f32 1.0, %v3550_v32 }
 0x5a2   :  { %3555 = vrcp.f32 %v1667_v61  ;;  %v2209_v61 = vld [vmem:[#allocation11 + $0xa0] sm:$0xff] }
 0x5a3   :  { %3557 = vrcp.f32 %v1674_v8  ;;  %v2217_v8 = vld [vmem:[#allocation11 + $0xe0] sm:$0xff] }
 0x5ab   :  { %v3554_v41 = vpop.eup %3553 }
 0x5ac   :  { %v3556_v45 = vpop.eup %3555  ;;  %v1679_v46 = vmul.f32 %v3554_v41, %v3552_v6  ;;  %v2214_v6 = vld [vmem:[#allocation11 + $0xc8] sm:$0xff] }
 0x5ad   :  { %v1678_v34 = vmul.f32 %v3556_v45, %v4430_v5  ;;  %v3558_v28 = vpop.eup %3557  ;;  %v2218_v41 = vld [vmem:[#allocation11 + $0xe8] sm:$0xff] }
 0x5ae   :  { %v3319_v45 = vpack.c.bf16 %v2218_v41, %v2214_v6 }
 0x5af   :  { %v4476_v37 = vadd.f32 %v1679_v46, %v1678_v34  ;;  %v2213_v46 = vld [vmem:[#allocation11 + $0xc0] sm:$0xff] }
 0x5b0   :  { %v3321_v34 = vpack.c.bf16 %v2217_v8, %v2213_v46 }
 0x5b1   :  { %3559 = vtanh.f32 %v4476_v37 }
 0x5bb   :  { %v3560_v13 = vpop.eup %3559 }
 0x5bc   :  { %v4479_v31 = vmul.f32 %v3560_v13, %v3558_v28  ;;  %v2226_v28 = vld [vmem:[#allocation11 + $0x128] sm:$0xff] }
 0x5be   :  { %1824 = vmatmul.mubr.f32.vlgmr.msra.gmra.mrb[10].mxu0 %v4479_v31  ;;  %1895 = vmatmul.mubr.f32.vlgmr.msra.gmra.mrb[26].mxu1 %v4479_v31 }
 0x5bf   :  { %3246 = vmatpush1.bf16.msra.mxu0 %v4298_v11  ;;  %3278 = vmatpush1.bf16.msra.mxu1 %v4380_v62 }
 0x5c0   :  { %3248 = vmatprep.subr.bf16.mxu0 %v4302_v27  ;;  %3280 = vmatprep.subr.bf16.mxu1 %v4384_v35 }
 0x5c1   :  { %2070 = vmatprep.mubr.f32.mxu0 %v4685_v48  ;;  %2141 = vmatprep.mubr.f32.mxu1 %v4685_v48 }
 0x5c3   :  { %3250 = vmatpush1.bf16.msra.mxu0 %v4304_v36  ;;  %3282 = vmatpush1.bf16.msra.mxu1 %v4386_v25 }
 0x5c4   :  { %3252 = vmatprep.subr.bf16.mxu0 %v4308_v19  ;;  %3284 = vmatprep.subr.bf16.mxu1 %v4390_v54 }
 0x5c7   :  { %3254 = vmatpush1.bf16.msra.mxu0 %v4310_v30  ;;  %3286 = vmatpush1.bf16.msra.mxu1 %v4392_v26 }
 0x5c8   :  { %3256 = vmatprep.subr.bf16.mxu0 %v4314_v0  ;;  %3288 = vmatprep.subr.bf16.mxu1 %v4396_v52 }
 0x5cb   :  { %3258 = vmatpush1.bf16.msra.mxu0 %v4316_v18  ;;  %3290 = vmatpush1.bf16.msra.mxu1 %v4398_v16 }
 0x5cc   :  { %3260 = vmatprep.subr.bf16.mxu0 %v4320_v39  ;;  %3292 = vmatprep.subr.bf16.mxu1 %v4402_v33 }
 0x5cf   :  { %3262 = vmatpush1.bf16.msra.mxu0 %v4322_v56  ;;  %3294 = vmatpush1.bf16.msra.mxu1 %v4404_v9 }
 0x5d0   :  { %3264 = vmatprep.subr.bf16.mxu0 %v4326_v23  ;;  %3296 = vmatprep.subr.bf16.mxu1 %v4408_v4 }
 0x5d3   :  { %3266 = vmatpush1.bf16.msra.mxu0 %v4328_v47  ;;  %3298 = vmatpush1.bf16.msra.mxu1 %v4410_v43 }
 0x5d4   :  { %3268 = vmatprep.subr.bf16.mxu0 %v4330_v49  ;;  %3300 = vmatprep.subr.bf16.mxu1 %v4412_v29 }
 0x5d7   :  { %3270 = vmatpush1.bf16.msra.mxu0 %v4334_v10  ;;  %3302 = vmatpush1.bf16.msra.mxu1 %v4416_v44 }
 0x5d8   :  { %3272 = vmatprep.subr.bf16.mxu0 %v4339_v59  ;;  %3304 = vmatprep.subr.bf16.mxu1 %v4419_v14 }
 0x5db   :  { %3274 = vmatpush1.bf16.msra.mxu0 %v4343_v12  ;;  %3306 = vmatpush1.bf16.msra.mxu1 %v4336_v58 }
 0x5dc   :  { %3340 = vmatprep.subr.bf16.mxu1 %v4378_v63 }
 0x691   :  { %v1825_v11 = vpop.f32.mrb[10].mxu0  ;;  %v1896_v27 = vpop.f32.mrb[26].mxu1 }
 0x692   :  { %v1901_v36 = vadd.f32 %v1825_v11, %v4210_v50  ;;  %v1827_v19 = vpop.f32.mrb[11].mxu0  ;;  %v1898_v30 = vpop.f32.mrb[27].mxu1  ;;  %v3445_v47 = vadd.f32 %v1896_v27, %v4222_v53  ;;  %v2221_v11 = vld [vmem:[#allocation11 + $0x100] sm:$0xff] }
 0x693   :  { %v1902_v0 = vadd.f32 %v1827_v19, %v4212_v57  ;;  %v3446_v56 = vadd.f32 %v1898_v30, %v4224_v55  ;;  %v2225_v27 = vld [vmem:[#allocation11 + $0x120] sm:$0xff]  ;;  %v2230_v19 = vld [vmem:[#allocation11 + $0x148] sm:$0xff] }
 0x694   :  { %v2749_v18 = vmul.f32 -1.442695, %v1901_v36  ;;  %v3325_v36 = vpack.c.bf16 %v2225_v27, %v2221_v11  ;;  %v2234_v30 = vld [vmem:[#allocation11 + $0x168] sm:$0xff] }
 0x695   :  { %v2750_v39 = vmul.f32 -1.442695, %v1902_v0  ;;  %v2751_v23 = vmul.f32 -1.442695, %v3446_v56  ;;  %v2229_v0 = vld [vmem:[#allocation11 + $0x140] sm:$0xff]  ;;  %v2238_v56 = vld [vmem:[#allocation11 + $0x188] sm:$0xff] }
 0x696   :  { %3561 = vpow2.f32 %v2749_v18  ;;  %v3327_v18 = vpack.c.bf16 %v2234_v30, %v2230_v19  ;;  %v2440_v19 = vld [vmem:[#allocation14 + $0x20] sm:$0xff]  ;;  %v2441_v30 = vld [vmem:[#allocation14 + $0x28] sm:$0xff] }
 0x697   :  { %3563 = vpow2.f32 %v2750_v39  ;;  %v2233_v39 = vld [vmem:[#allocation11 + $0x160] sm:$0xff] }
 0x698   :  { %3565 = vpow2.f32 %v2751_v23  ;;  %v2242_v23 = vld [vmem:[#allocation11 + $0x1a8] sm:$0xff] }
 0x699   :  { %3567 = vtanh.f32 %v3445_v47  ;;  %v3329_v47 = vpack.c.bf16 %v2233_v39, %v2229_v0  ;;  %v2442_v0 = vld [vmem:[#allocation14 + $0x30] sm:$0xff] }
 0x6a0   :  { %v3562_v49 = vpop.eup %3561 }
 0x6a1   :  { %v3564_v10 = vpop.eup %3563  ;;  %v1908_v58 = vadd.f32 1.0, %v3562_v49  ;;  %v3331_v49 = vpack.c.bf16 %v2242_v23, %v2238_v56  ;;  %v2444_v56 = vld [vmem:[#allocation14 + $0x40] sm:$0xff]  ;;  %v2445_v23 = vld [vmem:[#allocation14 + $0x48] sm:$0xff] }
 0x6a2   :  { %v1914_v59 = vadd.f32 1.0, %v3564_v10  ;;  %v3566_v50 = vpop.eup %3565  ;;  %v2237_v10 = vld [vmem:[#allocation11 + $0x180] sm:$0xff] }
 0x6a3   :  { %3569 = vrcp.f32 %v1908_v58  ;;  %v3568_v12 = vpop.eup %3567  ;;  %v1921_v21 = vadd.f32 1.0, %v3566_v50  ;;  %v2241_v58 = vld [vmem:[#allocation11 + $0x1a0] sm:$0xff]  ;;  %v2250_v50 = vld [vmem:[#allocation11 + $0x1e8] sm:$0xff] }
 0x6a4   :  { %3571 = vrcp.f32 %v1914_v59  ;;  %v2246_v59 = vld [vmem:[#allocation11 + $0x1c8] sm:$0xff] }
 0x6a5   :  { %3573 = vrcp.f32 %v1921_v21  ;;  %v2245_v21 = vld [vmem:[#allocation11 + $0x1c0] sm:$0xff] }
 0x6ad   :  { %v3570_v57 = vpop.eup %3569 }
 0x6ae   :  { %v3572_v63 = vpop.eup %3571  ;;  %v1926_v5 = vmul.f32 %v3570_v57, %v3568_v12  ;;  %v3333_v12 = vpack.c.bf16 %v2241_v58, %v2237_v10  ;;  %v2247_v57 = vld [vmem:[#allocation11 + $0x1d0] sm:$0xff]  ;;  %v2447_v10 = vld [vmem:[#allocation14 + $0x58] sm:$0xff] }
 0x6af   :  { %v1925_v2 = vmul.f32 %v3572_v63, %v4476_v37  ;;  %v3574_v17 = vpop.eup %3573  ;;  %v2222_v37 = vld [vmem:[#allocation11 + $0x108] sm:$0xff]  ;;  %v2251_v63 = vld [vmem:[#allocation11 + $0x1f0] sm:$0xff] }
 0x6b0   :  { %v3323_v13 = vpack.c.bf16 %v2226_v28, %v2222_v37  ;;  %v2438_v37 = vld [vmem:[#allocation14 + $0x10] sm:$0xff]  ;;  %v2439_v28 = vld [vmem:[#allocation14 + $0x18] sm:$0xff] }
 0x6b1   :  { %v4521_v24 = vadd.f32 %v1926_v5, %v1925_v2  ;;  %v3335_v5 = vpack.c.bf16 %v2250_v50, %v2246_v59  ;;  %v2249_v2 = vld [vmem:[#allocation11 + $0x1e0] sm:$0xff]  ;;  %v2449_v50 = vld [vmem:[#allocation14 + $0x68] sm:$0xff] }
 0x6b2   :  { %v2448_v59 = vld [vmem:[#allocation14 + $0x60] sm:$0xff] }
 0x6b3   :  { %3575 = vtanh.f32 %v4521_v24 }
 0x6bd   :  { %v3576_v3 = vpop.eup %3575 }
 0x6be   :  { %v4524_v38 = vmul.f32 %v3576_v3, %v3574_v17  ;;  %v3369_v17 = vpack.c.bf16 %v2251_v63, %v2247_v57  ;;  %v2436_v3 = vld [vmem:[#allocation14] sm:$0xff]  ;;  %v2451_v57 = vld [vmem:[#allocation14 + $0x78] sm:$0xff] }
 0x6c0   :  { %2071 = vmatmul.mubr.f32.vlgmr.msra.gmra.mrb[12].mxu0 %v4524_v38  ;;  %2142 = vmatmul.mubr.f32.vlgmr.msra.gmra.mrb[28].mxu1 %v4524_v38 }
 0x6c1   :  { %3342 = vmatpush1.bf16.msra.mxu1 %v4380_v62  ;;  %2317 = vmatprep.mubr.f32.mxu0 %v4685_v48  ;;  %v2194_v62 = vld [vmem:[#allocation11 + $0x28] sm:$0xff] }
 0x6c2   :  { %3344 = vmatprep.subr.bf16.mxu1 %v4384_v35  ;;  %2388 = vmatprep.mubr.f32.mxu1 %v4685_v48  ;;  %v2190_v48 = vld [vmem:[#allocation11 + $0x8] sm:$0xff] }
 0x6c3   :  { %v3307_v35 = vpack.c.bf16 %v2194_v62, %v2190_v48  ;;  %v2437_v48 = vld [vmem:[#allocation14 + $0x8] sm:$0xff]  ;;  %v3337_v62 = vpack.c.bf16 %v2249_v2, %v2245_v21 }
 0x6c5   :  { %3346 = vmatpush1.bf16.msra.mxu1 %v4386_v25  ;;  %v2189_v25 = vld [vmem:[#allocation11] sm:$0xff]  ;;  %3308 = vmatprep.subr.bf16.mxu0 %v3307_v35  ;;  %v3371_v35 = vpack.c.bf16 %v2437_v48, %v2436_v3 }
 0x6c6   :  { %3348 = vmatprep.subr.bf16.mxu1 %v4390_v54  ;;  %v2193_v54 = vld [vmem:[#allocation11 + $0x20] sm:$0xff] }
 0x6c9   :  { %3350 = vmatpush1.bf16.msra.mxu1 %v4392_v26  ;;  %v3309_v26 = vpack.c.bf16 %v2193_v54, %v2189_v25 }
 0x6ca   :  { %3352 = vmatprep.subr.bf16.mxu1 %v4396_v52  ;;  %v2198_v52 = vld [vmem:[#allocation11 + $0x48] sm:$0xff] }
 0x6cb   :  { %3310 = vmatpush1.bf16.msra.mxu0 %v3309_v26 }
 0x6cd   :  { %3354 = vmatpush1.bf16.msra.mxu1 %v4398_v16  ;;  %v2202_v16 = vld [vmem:[#allocation11 + $0x68] sm:$0xff] }
 0x6ce   :  { %3356 = vmatprep.subr.bf16.mxu1 %v4402_v33  ;;  %v3311_v33 = vpack.c.bf16 %v2202_v16, %v2198_v52 }
 0x6d0   :  { %3312 = vmatprep.subr.bf16.mxu0 %v3311_v33 }
 0x6d1   :  { %3358 = vmatpush1.bf16.msra.mxu1 %v4404_v9  ;;  %v2197_v9 = vld [vmem:[#allocation11 + $0x40] sm:$0xff] }
 0x6d2   :  { %3360 = vmatprep.subr.bf16.mxu1 %v4408_v4  ;;  %v2201_v4 = vld [vmem:[#allocation11 + $0x60] sm:$0xff] }
 0x6d5   :  { %3362 = vmatpush1.bf16.msra.mxu1 %v4410_v43  ;;  %v3313_v43 = vpack.c.bf16 %v2201_v4, %v2197_v9 }
 0x6d6   :  { %3364 = vmatprep.subr.bf16.mxu1 %v4412_v29  ;;  %v2206_v29 = vld [vmem:[#allocation11 + $0x88] sm:$0xff] }
 0x6d7   :  { %3314 = vmatpush1.bf16.msra.mxu0 %v3313_v43 }
 0x6d9   :  { %3366 = vmatpush1.bf16.msra.mxu1 %v4416_v44  ;;  %v2210_v44 = vld [vmem:[#allocation11 + $0xa8] sm:$0xff] }
 0x6da   :  { %3368 = vmatprep.subr.bf16.mxu1 %v4419_v14  ;;  %v3315_v40 = vpack.c.bf16 %v2210_v44, %v2206_v29  ;;  %v2205_v14 = vld [vmem:[#allocation11 + $0x80] sm:$0xff] }
 0x6db   :  { %v3317_v32 = vpack.c.bf16 %v2209_v61, %v2205_v14 }
 0x6dc   :  { %3316 = vmatprep.subr.bf16.mxu0 %v3315_v40 }
 0x6dd   :  { %3318 = vmatpush1.bf16.msra.mxu0 %v3317_v32  ;;  %3370 = vmatpush1.bf16.msra.mxu1 %v3369_v17 }
 0x6de   :  { %3320 = vmatprep.subr.bf16.mxu0 %v3319_v45 }
 0x6e1   :  { %3322 = vmatpush1.bf16.msra.mxu0 %v3321_v34 }
 0x6e2   :  { %3324 = vmatprep.subr.bf16.mxu0 %v3323_v13 }
 0x6e5   :  { %3326 = vmatpush1.bf16.msra.mxu0 %v3325_v36  ;;  %v3375_v36 = vpack.c.bf16 %v2439_v28, %v2438_v37 }
 0x6e6   :  { %3328 = vmatprep.subr.bf16.mxu0 %v3327_v18  ;;  %v2443_v18 = vld [vmem:[#allocation14 + $0x38] sm:$0xff] }
 0x6e7   :  { %v3383_v39 = vpack.c.bf16 %v2443_v18, %v2442_v0 }
 0x6e9   :  { %3330 = vmatpush1.bf16.msra.mxu0 %v3329_v47  ;;  %v3387_v47 = vpack.c.bf16 %v2445_v23, %v2444_v56 }
 0x6ea   :  { %3332 = vmatprep.subr.bf16.mxu0 %v3331_v49  ;;  %v2446_v49 = vld [vmem:[#allocation14 + $0x50] sm:$0xff] }
 0x6eb   :  { %v3391_v58 = vpack.c.bf16 %v2447_v10, %v2446_v49 }
 0x6ed   :  { %3334 = vmatpush1.bf16.msra.mxu0 %v3333_v12  ;;  %v2450_v12 = vld [vmem:[#allocation14 + $0x70] sm:$0xff] }
 0x6ee   :  { %3336 = vmatprep.subr.bf16.mxu0 %v3335_v5  ;;  %v3399_v63 = vpack.c.bf16 %v2451_v57, %v2450_v12 }
 0x6f1   :  { %3338 = vmatpush1.bf16.msra.mxu0 %v3337_v62 }
 0x6f2   :  { %3372 = vmatprep.subr.bf16.mxu0 %v3371_v35 }
 0x793   :  { %v2072_v25 = vpop.f32.mrb[12].mxu0  ;;  %v2143_v54 = vpop.f32.mrb[28].mxu1 }
 0x794   :  { %v2148_v26 = vadd.f32 %v2072_v25, %v4214_v7  ;;  %v2074_v52 = vpop.f32.mrb[13].mxu0  ;;  %v2145_v16 = vpop.f32.mrb[29].mxu1  ;;  %v3447_v44 = vadd.f32 %v2143_v54, %v4222_v53 }
 0x795   :  { %v2149_v33 = vadd.f32 %v2074_v52, %v4216_v60  ;;  %v3448_v43 = vadd.f32 %v2145_v16, %v4224_v55 }
 0x796   :  { %v2752_v9 = vmul.f32 -1.442695, %v2148_v26 }
 0x797   :  { %v2753_v4 = vmul.f32 -1.442695, %v2149_v33  ;;  %v2754_v29 = vmul.f32 -1.442695, %v3448_v43 }
 0x798   :  { %3577 = vpow2.f32 %v2752_v9 }
 0x799   :  { %3579 = vpow2.f32 %v2753_v4 }
 0x79a   :  { %3581 = vpow2.f32 %v2754_v29 }
 0x79b   :  { %3583 = vtanh.f32 %v3447_v44 }
 0x7a2   :  { %v3578_v40 = vpop.eup %3577 }
 0x7a3   :  { %v3580_v14 = vpop.eup %3579  ;;  %v2155_v61 = vadd.f32 1.0, %v3578_v40 }
 0x7a4   :  { %v2161_v32 = vadd.f32 1.0, %v3580_v14  ;;  %v3582_v7 = vpop.eup %3581 }
 0x7a5   :  { %3585 = vrcp.f32 %v2155_v61  ;;  %v3584_v6 = vpop.eup %3583  ;;  %v2168_v46 = vadd.f32 1.0, %v3582_v7 }
 0x7a6   :  { %3587 = vrcp.f32 %v2161_v32 }
 0x7a7   :  { %3589 = vrcp.f32 %v2168_v46 }
 0x7af   :  { %v3586_v60 = vpop.eup %3585 }
 0x7b0   :  { %v3588_v41 = vpop.eup %3587  ;;  %v2173_v45 = vmul.f32 %v3586_v60, %v3584_v6 }
 0x7b1   :  { %v2172_v8 = vmul.f32 %v3588_v41, %v4521_v24  ;;  %v3590_v13 = vpop.eup %3589  ;;  %v3379_v24 = vpack.c.bf16 %v2441_v30, %v2440_v19 }
 0x7b3   :  { %v4549_v34 = vadd.f32 %v2173_v45, %v2172_v8 }
 0x7b5   :  { %3591 = vtanh.f32 %v4549_v34 }
 0x7bf   :  { %v3592_v11 = vpop.eup %3591 }
 0x7c0   :  { %v2176_v27 = vmul.f32 %v3592_v11, %v3590_v13 }
 0x7c2   :  { %2318 = vmatmul.mubr.f32.vlgmr.msra.gmra.mrb[14].mxu0 %v2176_v27  ;;  %2389 = vmatmul.mubr.f32.vlgmr.msra.gmra.mrb[30].mxu1 %v2176_v27 }
 0x7c3   :  { %3374 = vmatpush3.bf16.msra.mxu0 %v3371_v35  ;;  %2815 = vmatprep.mubr.f32.mxu0 %v4231_v42  ;;  %v3395_v42 = vpack.c.bf16 %v2449_v50, %v2448_v59 }
 0x7c4   :  { %3376 = vmatprep.subr.bf16.mxu0 %v3375_v36 }
 0x7c7   :  { %3378 = vmatpush3.bf16.msra.mxu0 %v3375_v36 }
 0x7c8   :  { %3380 = vmatprep.subr.bf16.mxu0 %v3379_v24 }
 0x7cb   :  { %3382 = vmatpush3.bf16.msra.mxu0 %v3379_v24 }
 0x7cc   :  { %3384 = vmatprep.subr.bf16.mxu0 %v3383_v39 }
 0x7cf   :  { %3386 = vmatpush3.bf16.msra.mxu0 %v3383_v39 }
 0x7d0   :  { %3388 = vmatprep.subr.bf16.mxu0 %v3387_v47 }
 0x7d3   :  { %3390 = vmatpush3.bf16.msra.mxu0 %v3387_v47 }
 0x7d4   :  { %3392 = vmatprep.subr.bf16.mxu0 %v3391_v58 }
 0x7d7   :  { %3394 = vmatpush3.bf16.msra.mxu0 %v3391_v58 }
 0x7d8   :  { %3396 = vmatprep.subr.bf16.mxu0 %v3395_v42 }
 0x7db   :  { %3398 = vmatpush3.bf16.msra.mxu0 %v3395_v42 }
 0x7dc   :  { %3400 = vmatprep.subr.bf16.mxu0 %v3399_v63 }
 0x7df   :  { %3402 = vmatpush3.bf16.msra.mxu0 %v3399_v63 }
 0x7e2   :  { %2816 = vmatmul.mubr.f32.vlgmr.msra.gmra.mrb[16].mxu0 %v4276_v51 }
 0x7e3   :  { %2818 = vmatprep.mubr.f32.mxu0 %v4356_v1 }
 0x7e6   :  { %2819 = vmatmul.mubr.f32.gmra.mrb[18].mxu0 %v4433_v20 }
 0x7e7   :  { %2821 = vmatprep.mubr.f32.mxu0 %v4479_v31 }
 0x7ea   :  { %2822 = vmatmul.mubr.f32.gmra.mrb[20].mxu0 %v4524_v38 }
 0x7eb   :  { %2824 = vmatprep.mubr.f32.mxu0 %v2176_v27 }
 0x895   :  { %v2319_v5 = vpop.f32.mrb[14].mxu0  ;;  %v2390_v21 = vpop.f32.mrb[30].mxu1 }
 0x896   :  { %v2395_v2 = vadd.f32 %v2319_v5, %v4218_v15  ;;  %v2321_v17 = vpop.f32.mrb[15].mxu0  ;;  %v2392_v3 = vpop.f32.mrb[31].mxu1  ;;  %v3449_v20 = vadd.f32 %v2390_v21, %v4222_v53 }
 0x897   :  { %v2396_v48 = vadd.f32 %v2321_v17, %v4220_v22  ;;  %v3450_v51 = vadd.f32 %v2392_v3, %v4224_v55  ;;  %v2758_v55 = vld [vmem:[#allocation15] ss:$0 sm:$0xff] }
 0x898   :  { %v2755_v62 = vmul.f32 -1.442695, %v2395_v2 }
 0x899   :  { %v2756_v35 = vmul.f32 -1.442695, %v2396_v48  ;;  %v2757_v1 = vmul.f32 -1.442695, %v3450_v51 }
 0x89a   :  { %3593 = vpow2.f32 %v2755_v62 }
 0x89b   :  { %3595 = vpow2.f32 %v2756_v35 }
 0x89c   :  { %3597 = vpow2.f32 %v2757_v1 }
 0x89d   :  { %3599 = vtanh.f32 %v3449_v20 }
 0x8a4   :  { %v3594_v31 = vpop.eup %3593 }
 0x8a5   :  { %v3596_v38 = vpop.eup %3595  ;;  %v2402_v25 = vadd.f32 1.0, %v3594_v31 }
 0x8a6   :  { %v2408_v54 = vadd.f32 1.0, %v3596_v38  ;;  %v3598_v15 = vpop.eup %3597 }
 0x8a7   :  { %3601 = vrcp.f32 %v2402_v25  ;;  %v3600_v26 = vpop.eup %3599  ;;  %v2415_v33 = vadd.f32 1.0, %v3598_v15 }
 0x8a8   :  { %3603 = vrcp.f32 %v2408_v54 }
 0x8a9   :  { %3605 = vrcp.f32 %v2415_v33 }
 0x8b1   :  { %v3602_v22 = vpop.eup %3601 }
 0x8b2   :  { %v3604_v52 = vpop.eup %3603  ;;  %v2420_v16 = vmul.f32 %v3602_v22, %v3600_v26 }
 0x8b3   :  { %v2419_v9 = vmul.f32 %v3604_v52, %v4549_v34  ;;  %v3606_v41 = vpop.eup %3605 }
 0x8b5   :  { %v2817_v4 = vpop.f32.mrb[16].mxu0  ;;  %v2421_v43 = vadd.f32 %v2420_v16, %v2419_v9 }
 0x8b6   :  { %v4563_v53 = vadd.f32 %v2817_v4, %v2758_v55  ;;  %v2525_v29 = vpop.f32.mrb[17].mxu0 }
 0x8b7   :  { %3607 = vtanh.f32 %v2421_v43  ;;  %2663 = vst [vmem:[#allocation20] sm:$0xff] %v2421_v43  ;;  %v4566_v40 = vadd.f32 %v2758_v55, %v2525_v29 }
 0x8b8   :  { %2566 = vmax.xlane.f32.xlu0 %v4563_v53 }
 0x8b9   :  { %v2820_v44 = vpop.f32.mrb[18].mxu0 }
 0x8ba   :  { %v4568_v14 = vadd.f32 %v2820_v44, %v2758_v55  ;;  %v2535_v61 = vpop.f32.mrb[19].mxu0 }
 0x8bb   :  { %v4572_v7 = vadd.f32 %v2758_v55, %v2535_v61 }
 0x8bc   :  { %2570 = vmax.xlane.f32.xlu1 %v4568_v14  ;;  %2564 = vmax.xlane.f32.xlu0 %v4566_v40 }
 0x8bd   :  { %v2823_v32 = vpop.f32.mrb[20].mxu0 }
 0x8be   :  { %v2545_v6 = vpop.f32.mrb[21].mxu0  ;;  %v4578_v46 = vadd.f32 %v2823_v32, %v2758_v55 }
 0x8bf   :  { %v4574_v60 = vadd.f32 %v2758_v55, %v2545_v6 }
 0x8c0   :  { %2568 = vmax.xlane.f32.xlu1 %v4572_v7 }
 0x8c1   :  { %v3608_v45 = vpop.eup %3607  ;;  %2572 = vmax.xlane.f32.xlu0 %v4574_v60 }
 0x8c2   :  { %v2423_v8 = vmul.f32 %v3608_v45, %v3606_v41 }
 0x8c4   :  { %2574 = vmax.xlane.f32.xlu1 %v4578_v46  ;;  %2825 = vmatmul.mubr.f32.gmra.mrb[22].mxu0 %v2423_v8  ;;  %2661 = vst [vmem:[#allocation18] sm:$0xff] %v2423_v8 }
 0x945   :  { %v4581_v34 = vpop.xlane.xlu0 %2566 }
 0x946   :  { %v2581_v11 = vsub.f32 %v4563_v53, %v4581_v34 }
 0x948   :  { %v2590_v36 = vmul.f32 1.442695, %v2581_v11 }
 0x949   :  { %v4583_v37 = vpop.xlane.xlu1 %2570  ;;  %v4585_v28 = vpop.xlane.xlu0 %2564 }
 0x94a   :  { %v2580_v27 = vsub.f32 %v4566_v40, %v4585_v28  ;;  %v2583_v19 = vsub.f32 %v4568_v14, %v4583_v37  ;;  %3609 = vpow2.f32 %v2590_v36 }
 0x94c   :  { %v2588_v30 = vmul.f32 1.442695, %v2580_v27  ;;  %v2594_v39 = vmul.f32 1.442695, %v2583_v19 }
 0x94d   :  { %v4587_v13 = vpop.xlane.xlu1 %2568 }
 0x94e   :  { %v2582_v24 = vsub.f32 %v4572_v7, %v4587_v13  ;;  %v4599_v18 = vpop.xlane.xlu0 %2572  ;;  %3611 = vpow2.f32 %v2588_v30 }
 0x94f   :  { %v2584_v47 = vsub.f32 %v4574_v60, %v4599_v18  ;;  %3613 = vpow2.f32 %v2594_v39 }
 0x950   :  { %v2592_v23 = vmul.f32 1.442695, %v2582_v24 }
 0x951   :  { %v4597_v0 = vpop.xlane.xlu1 %2574  ;;  %v2596_v58 = vmul.f32 1.442695, %v2584_v47 }
 0x952   :  { %v2585_v56 = vsub.f32 %v4578_v46, %v4597_v0  ;;  %3615 = vpow2.f32 %v2592_v23 }
 0x954   :  { %v2598_v49 = vmul.f32 1.442695, %v2585_v56  ;;  %v3610_v12 = vpop.eup %3609 }
 0x956   :  { %3617 = vpow2.f32 %v2598_v49 }
 0x957   :  { %3619 = vpow2.f32 %v2596_v58 }
 0x958   :  { %v3612_v57 = vpop.eup %3611 }
 0x959   :  { %v3614_v63 = vpop.eup %3613 }
 0x95c   :  { %v3616_v5 = vpop.eup %3615 }
 0x960   :  { %v3618_v21 = vpop.eup %3617 }
 0x961   :  { %v3620_v2 = vpop.eup %3619 }
 0x997   :  { %v2826_v10 = vpop.f32.mrb[22].mxu0 }
 0x998   :  { %v4605_v59 = vadd.f32 %v2826_v10, %v2758_v55  ;;  %v2555_v50 = vpop.f32.mrb[23].mxu0 }
 0x999   :  { %v4607_v42 = vadd.f32 %v2758_v55, %v2555_v50 }
 0x99a   :  { %2578 = vmax.xlane.f32.xlu1 %v4605_v59 }
 0x99b   :  { %2576 = vmax.xlane.f32.xlu0 %v4607_v42 }
 0x99e   :  { %2606 = vadd.xlane.f32.xlu1 %v3610_v12 }
 0x99f   :  { %2604 = vadd.xlane.f32.xlu0 %v3612_v57 }
 0x9a2   :  { %2610 = vadd.xlane.f32.xlu1 %v3614_v63 }
 0x9a3   :  { %2608 = vadd.xlane.f32.xlu0 %v3616_v5 }
 0x9a6   :  { %2614 = vadd.xlane.f32.xlu1 %v3618_v21 }
 0x9a7   :  { %2612 = vadd.xlane.f32.xlu0 %v3620_v2 }
 0xa27   :  { %v4611_v17 = vpop.xlane.xlu1 %2578 }
 0xa28   :  { %v2587_v3 = vsub.f32 %v4605_v59, %v4611_v17  ;;  %v4615_v48 = vpop.xlane.xlu0 %2576 }
 0xa29   :  { %v2586_v62 = vsub.f32 %v4607_v42, %v4615_v48 }
 0xa2a   :  { %v2602_v35 = vmul.f32 1.442695, %v2587_v3 }
 0xa2b   :  { %v2600_v51 = vmul.f32 1.442695, %v2586_v62  ;;  %v2607_v1 = vpop.xlane.xlu1 %2606 }
 0xa2c   :  { %3621 = vpow2.f32 %v2602_v35  ;;  %v2605_v20 = vpop.xlane.xlu0 %2604 }
 0xa2d   :  { %3623 = vpow2.f32 %v2600_v51 }
 0xa2e   :  { %3625 = vlog2.f32 %v2607_v1 }
 0xa2f   :  { %3627 = vlog2.f32 %v2605_v20  ;;  %v2611_v31 = vpop.xlane.xlu1 %2610 }
 0xa30   :  { %3629 = vlog2.f32 %v2611_v31  ;;  %v2609_v38 = vpop.xlane.xlu0 %2608 }
 0xa31   :  { %3631 = vlog2.f32 %v2609_v38 }
 0xa33   :  { %v2615_v25 = vpop.xlane.xlu1 %2614 }
 0xa34   :  { %3633 = vlog2.f32 %v2615_v25  ;;  %v2613_v54 = vpop.xlane.xlu0 %2612 }
 0xa35   :  { %3635 = vlog2.f32 %v2613_v54 }
 0xa36   :  { %v3622_v15 = vpop.eup %3621 }
 0xa37   :  { %v3624_v26 = vpop.eup %3623  ;;  %2618 = vadd.xlane.f32.xlu1 %v3622_v15 }
 0xa38   :  { %v3626_v22 = vpop.eup %3625  ;;  %2616 = vadd.xlane.f32.xlu0 %v3624_v26 }
 0xa39   :  { %v3628_v52 = vpop.eup %3627  ;;  %v2623_v16 = vmul.f32 0.6931472, %v3626_v22 }
 0xa3a   :  { %v3630_v33 = vpop.eup %3629  ;;  %v2621_v9 = vmul.f32 0.6931472, %v3628_v52 }
 0xa3b   :  { %v3632_v55 = vpop.eup %3631  ;;  %v2637_v4 = vadd.f32 %v2623_v16, %v4581_v34  ;;  %v2627_v43 = vmul.f32 0.6931472, %v3630_v33 }
 0xa3c   :  { %v2636_v29 = vadd.f32 %v2621_v9, %v4585_v28  ;;  %v2625_v44 = vmul.f32 0.6931472, %v3632_v55 }
 0xa3d   :  { %v2645_v61 = vsub.f32 %v4563_v53, %v2637_v4  ;;  %v2639_v32 = vadd.f32 %v2627_v43, %v4583_v37 }
 0xa3e   :  { %v3634_v6 = vpop.eup %3633  ;;  %v2644_v41 = vsub.f32 %v4566_v40, %v2636_v29  ;;  %v2638_v45 = vadd.f32 %v2625_v44, %v4587_v13 }
 0xa3f   :  { %v3636_v8 = vpop.eup %3635  ;;  %2653 = vst [vmem:[#allocation17 + $0x8] sm:$0xff] %v2645_v61  ;;  %v2647_v11 = vsub.f32 %v4568_v14, %v2639_v32  ;;  %v2631_v27 = vmul.f32 0.6931472, %v3634_v6 }
 0xa40   :  { %2652 = vst [vmem:[#allocation17] sm:$0xff] %v2644_v41  ;;  %v2646_v34 = vsub.f32 %v4572_v7, %v2638_v45  ;;  %v2629_v36 = vmul.f32 0.6931472, %v3636_v8 }
 0xa41   :  { %2655 = vst [vmem:[#allocation17 + $0x18] sm:$0xff] %v2647_v11  ;;  %v2641_v28 = vadd.f32 %v2631_v27, %v4597_v0 }
 0xa42   :  { %2654 = vst [vmem:[#allocation17 + $0x10] sm:$0xff] %v2646_v34  ;;  %v2640_v53 = vadd.f32 %v2629_v36, %v4599_v18 }
 0xa43   :  { %v2649_v37 = vsub.f32 %v4578_v46, %v2641_v28 }
 0xa44   :  { %v2648_v40 = vsub.f32 %v4574_v60, %v2640_v53 }
 0xa45   :  { %2657 = vst [vmem:[#allocation17 + $0x28] sm:$0xff] %v2649_v37 }
 0xa46   :  { %2656 = vst [vmem:[#allocation17 + $0x20] sm:$0xff] %v2648_v40 }
 0xa47   :  { %3784 = shalt.err (!%p3781_p10)
}
 0xa48   :  { %s3785_s17 = scalar_lea.hbm %s4681_s7, 128 }
 0xa49   :  { %p3786_p11 = scmp.ne.s32.totalorder %s4681_s7, %s3785_s17  ;;  %p3789_p12 = scmp.lt.u32.totalorder %s3785_s17, %s4681_s7 }
 0xa4b   :  { %p3791_p13 = pnand %p3789_p12, %p3786_p11 }
 0xa4d   :  { %3794 = shalt.err (!%p3791_p13)
}
 0xa4e   :  { %2685 = dma.vmem_to_hbm [thread:$0]  %s2683_s22, 128, %s4681_s7, [#allocation19]  }
 0xa4f   :  { %s3863_s15 = smov [#allocation20]  }
 0xa50   :  { %s2692_s16 = sshll.u32 %s3863_s15, 4  ;;  %s2693_s16 = int_to_ptr.vmem [resolvable:$true] %s2692_s16 }
 0xa51   :  { %s3795_s25 = scalar_lea.vmem %s2693_s16, 128  ;;  %p3800_p1 = scmp.lt.s32.totalorder %s2693_s16, %s2693_s16 }
 0xa52   :  { %p3796_p0 = scmp.ne.s32.totalorder %s2693_s16, %s3795_s25  ;;  %p3801_p2 = scmp.lt.s32.totalorder %s3795_s25, %s3795_s25 }
 0xa54   :  { %p3802_p3 = por %p3801_p2, %p3800_p1 }
 0xa56   :  { %p3803_p4 = pnand %p3802_p3, %p3796_p0 }
 0xa58   :  { %3806 = shalt.err (!%p3803_p4)
}
 0xa59   :  { %s3807_s30 = scalar_lea.hbm %s4682_s8, 128 }
 0xa5a   :  { %p3808_p5 = scmp.ne.s32.totalorder %s4682_s8, %s3807_s30  ;;  %p3811_p6 = scmp.lt.u32.totalorder %s3807_s30, %s4682_s8 }
 0xa5c   :  { %p3813_p7 = pnand %p3811_p6, %p3808_p5 }
 0xa5e   :  { %3816 = shalt.err (!%p3813_p7)
}
 0xa5f   :  { %2695 = dma.vmem_to_hbm [thread:$0]  %s2693_s16, 128, %s4682_s8, [#allocation19]  }
 0xa60   :  { %s3864_s4 = smov [#allocation17]  }
 0xa61   :  { %s2669_s27 = sshll.u32 %s3864_s4, 4  ;;  %s2670_s27 = int_to_ptr.vmem [resolvable:$true] %s2669_s27 }
 0xa62   :  { %s3817_s8 = scalar_lea.vmem %s2670_s27, 1024  ;;  %p3822_p9 = scmp.lt.s32.totalorder %s2670_s27, %s2670_s27 }
 0xa63   :  { %p3818_p8 = scmp.ne.s32.totalorder %s2670_s27, %s3817_s8  ;;  %p3823_p10 = scmp.lt.s32.totalorder %s3817_s8, %s3817_s8 }
 0xa65   :  { %p3824_p11 = por %p3823_p10, %p3822_p9 }
 0xa67   :  { %p3825_p12 = pnand %p3824_p11, %p3818_p8 }
 0xac4   :  { %v2619_v14 = vpop.xlane.xlu1 %2618 }
 0xac5   :  { %3637 = vlog2.f32 %v2619_v14  ;;  %v2617_v7 = vpop.xlane.xlu0 %2616 }
 0xac6   :  { %3639 = vlog2.f32 %v2617_v7 }
 0xacf   :  { %v3638_v60 = vpop.eup %3637 }
 0xad0   :  { %v3640_v46 = vpop.eup %3639  ;;  %v2635_v13 = vmul.f32 0.6931472, %v3638_v60 }
 0xad1   :  { %v2633_v19 = vmul.f32 0.6931472, %v3640_v46 }
 0xad2   :  { %v2643_v30 = vadd.f32 %v2635_v13, %v4611_v17 }
 0xad3   :  { %v2642_v24 = vadd.f32 %v2633_v19, %v4615_v48 }
 0xad4   :  { %v2651_v0 = vsub.f32 %v4605_v59, %v2643_v30 }
 0xad5   :  { %v2650_v18 = vsub.f32 %v4607_v42, %v2642_v24 }
 0xad6   :  { %2659 = vst [vmem:[#allocation17 + $0x38] sm:$0xff] %v2651_v0 }
 0xad7   :  { %2658 = vst [vmem:[#allocation17 + $0x30] sm:$0xff] %v2650_v18 }
 0xad8   :  { %3828 = shalt.err (!%p3825_p12)
}
 0xad9   :  { %s3829_s22 = scalar_lea.hbm %s4680_s6, 1024 }
 0xada   :  { %p3830_p13 = scmp.ne.s32.totalorder %s4680_s6, %s3829_s22  ;;  %p3833_p0 = scmp.lt.u32.totalorder %s3829_s22, %s4680_s6 }
 0xadc   :  { %p3835_p1 = pnand %p3833_p0, %p3830_p13 }
 0xade   :  { %3838 = shalt.err (!%p3835_p1)
}
 0xadf   :  { %2675 = dma.vmem_to_hbm [thread:$0]  %s2670_s27, 1024, %s4680_s6, [#allocation8], %s3856_s3, %s3856_s3, %s3857_s20  }
 0xae0   :  { %3847 = dma.done.wait [#allocation8], 1024  }
 0xae1   :  { %3848 = vsyncadd [#allocation8], 4294966272 }
 0xae2   :  { %3849 = dma.done.wait [#allocation19], 256  }
 0xae3   :  { %3850 = vsyncadd [#allocation19], 4294967040 }
 0xae4   :  { %2705 = vsyncpa [#allocation7], 1 }
 0xae5   :  { %2706 = vsyncpa [#allocation10], 1 }
 0xae6   :  { %2707 = vsyncpa [#allocation13], 1 }
 0xae7   :  { %2708 = vsyncpa [#allocation16], 1 }
 0xae8   :  { %2709 = vsyncpa [#allocation8], 1 }
 0xae9   :  { %2710 = vsyncpa [#allocation19], 1 }

</bundles_post_ra>
